<compile_context>
chip_gen: v7x
topology: tpu7x:2x2x1
jax: 0.10.0
libtpu: 0.0.40
codegen_flags: <defaults>
</compile_context>

<pallas_src>
import jax
import jax.numpy as jnp
import numpy as np
from jax.experimental import pallas as pl
from jax.experimental.pallas import tpu as pltpu


# --------------------------- shared kernel helpers -------------------------- #
def _se(v, w1, w2):
    """Squeeze-excite MLP on tiny pooled vectors. v: (n, half); w: (out, in)."""
    h = jnp.maximum(jnp.sum(v[:, None, :] * w1[None, :, :], axis=-1), 0.0)
    return jnp.sum(h[:, None, :] * w2[None, :, :], axis=-1)


def _branch_multiplier(xf, sa_g, w1, w2, half, inv_hw):
    """Per-element attention multiplier for one shuffle half.

    xf:   (n, cpg, hw) f32 slab (pre-shuffle channel order)
    sa_g: (n, hw)      f32 spatial-attention map per group
    Returns (n, cpg, hw): rows ch<half use sa, rows ch>=half use the SE scale.
    """
    n, cpg, hw = xf.shape
    # Pooled stats over the FULL tile (cheap lane reduction on idle XLU slots);
    # only the tiny pooled matrix is sliced, never the big slab (half may be <8).
    mx = jnp.max(xf, axis=-1)                      # (n, cpg)
    av = jnp.sum(xf, axis=-1) * inv_hw             # (n, cpg)
    logits = _se(mx[:, half:], w1, w2) + _se(av[:, half:], w1, w2)
    ca = jax.nn.sigmoid(logits)                    # (n, half)
    ca_pad = jnp.concatenate(
        [jnp.zeros((n, half), jnp.float32), ca], axis=1)           # (n, cpg)
    # Full-tile select — avoids masked sub-tile loads/stores entirely.
    ch_mask = jax.lax.broadcasted_iota(jnp.int32, (1, cpg, hw), 1) < half
    return jnp.where(ch_mask, sa_g[:, None, :], ca_pad[:, :, None])


# ----------------- Path 1: fused-residual kernel (1R + 1W) ------------------ #
def _sda_fused_kernel(x_ref, sa_ref, w1_ref, w2_ref, out_ref):
    # x_ref : (1, c, hw)            x, natural channel order, lane-dense
    # sa_ref: (1, 2, g_half, hw)    spatial-attention map (f32)
    # out   : (1, g_half, cpg, 2*hw) channel-shuffled output (+ residual fused)
    c, hw = x_ref.shape[1], x_ref.shape[2]
    g_half = sa_ref.shape[2]
    half = w1_ref.shape[0]
    chalf = c // 2
    cpg = chalf // g_half
    inv_hw = 1.0 / hw
    w1 = w1_ref[...]
    w2 = w2_ref[...]

    for g in range(2):                                        # static unroll
        # Compute slab: pre-shuffle channels [g*c/2, (g+1)*c/2) (tile-aligned).
        xf = x_ref[0, g * chalf:(g + 1) * chalf, :].astype(jnp.float32)
        xf = xf.reshape(g_half, cpg, hw)
        sa_g = sa_ref[0, g]                                   # (g_half, hw)
        mult = _branch_multiplier(xf, sa_g, w1, w2, half, inv_hw)
        r = xf * mult                                         # (g_half, cpg, hw)

        # Residual for output lane-half g: x channels {2m+g} in m-order — one
        # stride-2 sublane read of the already-resident block (no extra HBM read).
        res = x_ref[0, pl.ds(g, chalf, 2), :].astype(jnp.float32)
        res = res.reshape(g_half, cpg, hw)

        lo = g * hw                                           # hw % 128 == 0
        out_ref[0, :, :, lo:lo + hw] = (r + res).astype(out_ref.dtype)


# ------------- Path 2: blocked fallback kernel (2R + 1W on x) --------------- #
def _sda_blocked_kernel(xin_ref, sa_ref, res_ref, w1_ref, w2_ref, out_ref):
    # xin_ref: (1, 2, gq, cpg, hw)  pre-shuffle groups (both shuffle halves)
    # sa_ref : (1, 2, g_half, hw)   full spatial-attention map (small, sliced by j)
    # res_ref: (1, gq, cpg, 2*hw)   residual, post-shuffle channel order
    # out_ref: (1, gq, cpg, 2*hw)
    gq, cpg, hw = xin_ref.shape[2], xin_ref.shape[3], xin_ref.shape[4]
    half = w1_ref.shape[0]
    inv_hw = 1.0 / hw
    w1 = w1_ref[...]
    w2 = w2_ref[...]
    off = pl.multiple_of(pl.program_id(1) * gq, gq)

    for g in range(2):                                        # static unroll
        xf = xin_ref[0, g].astype(jnp.float32)                # (gq, cpg, hw)
        sa_g = sa_ref[0, g, pl.ds(off, gq), :]                # (gq, hw)
        mult = _branch_multiplier(xf, sa_g, w1, w2, half, inv_hw)
        r = xf * mult
        lo = g * hw
        res = res_ref[0, :, :, lo:lo + hw].astype(jnp.float32)
        out_ref[0, :, :, lo:lo + hw] = (r + res).astype(out_ref.dtype)


# ------------------------------ host wrapper -------------------------------- #
def _vmem_capacity_bytes():
    try:
        return int(pltpu.get_tpu_info().vmem_capacity_bytes)
    except Exception:
        return 64 * 1024 * 1024       # conservative (v7x per-TensorCore VMEM)


def _pick_gq(g_half, cpg, hw, itemsize, budget, b):
    """Largest divisor of g_half whose full footprint (double-buffered xin/res/out
    blocks + f32 temporaries + sa) fits the budget; prefers >=2 total grid steps."""
    def est(gq):
        io = 12 * gq * cpg * hw * itemsize      # 2x double-buffer x (xin+res+out)
        tmp = 4 * gq * cpg * hw * 4             # f32 in-kernel temporaries
        sa = 4 * 2 * g_half * hw * 4            # full sa block, double buffered
        return io + tmp + sa

    divisors = [d for d in range(1, g_half + 1) if g_half % d == 0]
    fitting = [d for d in divisors if est(d) <= budget] or [1]
    multi = [d for d in fitting if b * (g_half // d) >= 2]
    return max(multi) if multi else max(fitting)


def shuffle_dual_attention(x, params, G, fuse_residual=None):
    b, c, h, w = x.shape
    assert c % (2 * G) == 0, "channel must be divisible by 2*G"
    assert G % 2 == 0, "fused channel-shuffle layout assumes even G (default G=8)"
    cpg = c // G                        # channels per shuffle group
    half = cpg // 2
    hw = h * w
    g_half = G // 2
    chalf = c // 2
    dt = x.dtype
    isz = x.dtype.itemsize

    # --- spatial-attention map on tiny (b*G, 2, h, w) pooled maps: XLA side ----
    # TODO(synk): could be folded in-kernel via 49 pltpu.roll lane shifts; kept in
    # XLA (review option b) — it re-reads only c/2 of x's channels (~25% extra read).
    xg = x.reshape(b * G, cpg, h, w)
    mx = jnp.max(xg[:, :half], axis=1, keepdims=True).astype(jnp.float32)
    av = jnp.mean(xg[:, :half].astype(jnp.float32), axis=1, keepdims=True)
    sa_in = jnp.concatenate([mx, av], axis=1)                        # (bG, 2, h, w)
    conv = jax.lax.conv_general_dilated(
        sa_in, params["sa_w"].astype(jnp.float32), (1, 1), [(3, 3), (3, 3)],
        dimension_numbers=("NCHW", "OIHW", "NCHW"))
    sa = jax.nn.sigmoid(conv + params["sa_b"].astype(jnp.float32).reshape(1, 1, 1, 1))
    sa = sa.reshape(b, 2, g_half, hw)                                # free reshape

    w1 = params["w1"].astype(jnp.float32)
    w2 = params["w2"].astype(jnp.float32)

    # --- per-generation VMEM budgeting ----------------------------------------
    cap = _vmem_capacity_bytes()
    budget = (6 * cap) // 10                       # headroom for compiler scratch
    vmem_limit = min(int(0.85 * cap), 112 * 1024 * 1024)

    fused_ok = (isz == 4                  # stride-2 sublane residual read: 32-bit rows
                and hw % 128 == 0
                and cpg % 8 == 0 and chalf % 8 == 0
                and b >= 2)               # >=2 grid steps (both v7x TensorCores busy)
    est_fused = 4 * c * hw * isz + 3 * c * hw * 4 + 4 * 2 * g_half * hw * 4
    if fuse_residual is None:
        fused = fused_ok and est_fused <= budget
    else:
        fused = bool(fuse_residual) and fused_ok and est_fused <= budget

    out_shape = jax.ShapeDtypeStruct((b, g_half, cpg, 2 * hw), dt)

    if fused:
        # Whole batch item per step: x read from HBM exactly once (1R + 1W).
        x2d = x.reshape(b, c, hw)                                    # free reshape
        cost = pl.CostEstimate(
            flops=int(6 * x.size),
            transcendentals=int(2 * b * G * half),
            bytes_accessed=int(2 * x.size * isz + sa.size * 4))
        out5 = pl.pallas_call(
            _sda_fused_kernel,
            out_shape=out_shape,
            grid=(b,),
            in_specs=[
                pl.BlockSpec((1, c, hw), lambda i: (i, 0, 0)),
                pl.BlockSpec((1, 2, g_half, hw), lambda i: (i, 0, 0, 0)),
                pl.BlockSpec((half, half), lambda i: (0, 0)),
                pl.BlockSpec((half, half), lambda i: (0, 0)),
            ],
            out_specs=pl.BlockSpec((1, g_half, cpg, 2 * hw), lambda i: (i, 0, 0, 0)),
            compiler_params=pltpu.CompilerParams(
                dimension_semantics=("parallel",),
                vmem_limit_bytes=vmem_limit),
            cost_estimate=cost,
        )(x2d, sa, w1, w2)
    else:
        # Blocked fallback: residual read as a second view of x (2R + 1W ~= 1.5x
        # the minimal traffic — documented roofline ceiling for this path).
        gq = _pick_gq(g_half, cpg, hw, isz, budget, b)
        xin = x.reshape(b, 2, g_half, cpg, hw)                       # free reshape
        res = x.reshape(b, g_half, cpg, 2 * hw)                      # free reshape
        cost = pl.CostEstimate(
            flops=int(6 * x.size),
            transcendentals=int(2 * b * G * half),
            bytes_accessed=int(3 * x.size * isz + sa.size * 4))
        out5 = pl.pallas_call(
            _sda_blocked_kernel,
            out_shape=out_shape,
            grid=(b, g_half // gq),
            in_specs=[
                pl.BlockSpec((1, 2, gq, cpg, hw), lambda i, j: (i, 0, j, 0, 0)),
                pl.BlockSpec((1, 2, g_half, hw), lambda i, j: (i, 0, 0, 0)),
                pl.BlockSpec((1, gq, cpg, 2 * hw), lambda i, j: (i, j, 0, 0)),
                pl.BlockSpec((half, half), lambda i, j: (0, 0)),
                pl.BlockSpec((half, half), lambda i, j: (0, 0)),
            ],
            out_specs=pl.BlockSpec((1, gq, cpg, 2 * hw), lambda i, j: (i, j, 0, 0)),
            compiler_params=pltpu.CompilerParams(
                dimension_semantics=("parallel", "parallel"),
                vmem_limit_bytes=vmem_limit),
            cost_estimate=cost,
        )(xin, sa, res, w1, w2)

    # (b, G//2, cpg, 2, hw) flattens exactly to the channel-shuffled NCHW layout.
    return out5.reshape(b, c, h, w)


# --------------------------- pure-JAX reference ------------------------------ #
def reference_forward(x, params, G):
    b, c, h, w = x.shape
    cpg = c // G
    half = cpg // 2
    xg = x.reshape(b * G, cpg, h, w)
    x0, x1 = xg[:, :half], xg[:, half:]

    mx = jnp.max(x0, axis=1, keepdims=True)
    av = jnp.mean(x0, axis=1, keepdims=True)
    cat = jnp.concatenate([mx, av], axis=1)
    conv = jax.lax.conv_general_dilated(
        cat, params["sa_w"], (1, 1), [(3, 3), (3, 3)],
        dimension_numbers=("NCHW", "OIHW", "NCHW"))
    sa = jax.nn.sigmoid(conv + params["sa_b"].reshape(1, 1, 1, 1))
    p_out = x0 * sa

    mxv = jnp.max(x1, axis=(2, 3), keepdims=True)
    avv = jnp.mean(x1, axis=(2, 3), keepdims=True)

    def se(v):
        v1 = jnp.einsum("oi,bihw->bohw", params["w1"], v)
        v1 = jnp.maximum(v1, 0.0)
        return jnp.einsum("oi,bihw->bohw", params["w2"], v1)

    ca = jax.nn.sigmoid(se(mxv) + se(avv))
    c_out = x1 * ca

    out = jnp.concatenate([p_out, c_out], axis=1).reshape(b, c, h, w)
    out = out.reshape(b, 2, c // 2, h, w).transpose(0, 2, 1, 3, 4).reshape(b, c, h, w)
    return out + x


# ----------------------------------- main ------------------------------------ #
if __name__ == "__main__":
    B, C, H, W = 2, 32, 16, 16
    G = 4
    half = C // (2 * G)              # channels seen by ChannelAttention (=4)

    key = jax.random.PRNGKey(0)
    k_x, k_saw, k_sab, k_w1, k_w2 = jax.random.split(key, 5)

    x = jax.random.normal(k_x, (B, C, H, W), dtype=jnp.float32)
    params = {
        # SpatialAttention: Conv2d(2, 1, 7, padding=3) weight + bias
        "sa_w": 0.05 * jax.random.normal(k_saw, (1, 2, 7, 7), dtype=jnp.float32),
        "sa_b": 0.05 * jax.random.normal(k_sab, (1,), dtype=jnp.float32),
        # ChannelAttention SE: Conv2d(half, half, 1, bias=False) x2, (out, in)
        "w1": 0.2 * jax.random.normal(k_w1, (half, half), dtype=jnp.float32),
        "w2": 0.2 * jax.random.normal(k_w2, (half, half), dtype=jnp.float32),
    }

    ref = jax.block_until_ready(reference_forward(x, params, G))

    fwd = jax.jit(shuffle_dual_attention, static_argnums=(2, 3))

    # f32: fused-residual path (x read from HBM once).  Defensive fallback to the
    # blocked 2-read path if this toolchain rejects the strided residual load.
    try:
        out = jax.block_until_ready(fwd(x, params, G, None))
    except Exception:
        out = jax.block_until_ready(fwd(x, params, G, False))
    np.testing.assert_allclose(np.asarray(out), np.asarray(ref), rtol=1e-4, atol=1e-4)

    # bf16 I/O: slabs stay bf16 end-to-end (half the HBM bytes); exercises the
    # blocked path since the fused residual read is gated to 32-bit rows.
    xb = x.astype(jnp.bfloat16)
    out_b = jax.block_until_ready(fwd(xb, params, G, False))
    ref_b = reference_forward(xb.astype(jnp.float32), params, G)
    np.testing.assert_allclose(np.asarray(out_b, dtype=np.float32),
                               np.asarray(ref_b), rtol=0.05, atol=0.08)

    print("KERNEL_OK")
</pallas_src>

<mosaic_0001>
module attributes {stable_mosaic.version = 11 : i64} {
  func.func @_sda_fused_kernel(%arg0: i32, %arg1: memref<1x32x256xf32, #tpu.memory_space<vmem>>, %arg2: memref<1x2x2x256xf32, #tpu.memory_space<vmem>>, %arg3: memref<4x4xf32, #tpu.memory_space<vmem>>, %arg4: memref<4x4xf32, #tpu.memory_space<vmem>>, %arg5: memref<1x2x8x512xf32, #tpu.memory_space<vmem>>) attributes {dimension_semantics = [#tpu.dimension_semantics<parallel>], iteration_bounds = array<i64: 2>, scalar_prefetch = 0 : i64, scratch_operands = 0 : i64, tpu.core_type = #tpu.core_type<tc>, window_params = [{transform_indices = @transform_0, window_bounds = array<i64: 1, 32, 256>}, {transform_indices = @transform_1, window_bounds = array<i64: 1, 2, 2, 256>}, {pipeline_mode = #tpu.pipeline_mode<synchronous>, transform_indices = @transform_2, window_bounds = array<i64: 4, 4>}, {pipeline_mode = #tpu.pipeline_mode<synchronous>, transform_indices = @transform_3, window_bounds = array<i64: 4, 4>}, {transform_indices = @transform_4, window_bounds = array<i64: 1, 2, 8, 512>}]} {
    %c0 = arith.constant 0 : index
    %c0_0 = arith.constant 0 : index
    %0 = vector.load %arg3[%c0, %c0_0] : memref<4x4xf32, #tpu.memory_space<vmem>>, vector<4x4xf32>
    %c0_1 = arith.constant 0 : index
    %c0_2 = arith.constant 0 : index
    %1 = vector.load %arg4[%c0_1, %c0_2] : memref<4x4xf32, #tpu.memory_space<vmem>>, vector<4x4xf32>
    %c0_3 = arith.constant 0 : index
    %c0_4 = arith.constant 0 : index
    %c0_5 = arith.constant 0 : index
    %2 = vector.load %arg1[%c0_3, %c0_4, %c0_5] : memref<1x32x256xf32, #tpu.memory_space<vmem>>, vector<1x16x256xf32>
    %3 = vector.shape_cast %2 : vector<1x16x256xf32> to vector<16x256xf32>
    %4 = vector.shape_cast %3 : vector<16x256xf32> to vector<2x8x256xf32>
    %c0_6 = arith.constant 0 : index
    %c0_7 = arith.constant 0 : index
    %c0_8 = arith.constant 0 : index
    %c0_9 = arith.constant 0 : index
    %5 = vector.load %arg2[%c0_6, %c0_7, %c0_8, %c0_9] : memref<1x2x2x256xf32, #tpu.memory_space<vmem>>, vector<1x1x2x256xf32>
    %6 = vector.shape_cast %5 : vector<1x1x2x256xf32> to vector<2x256xf32>
    %cst = arith.constant dense<0xFF800000> : vector<2x8xf32>
    %7 = vector.multi_reduction <maximumf>, %4, %cst [2] : vector<2x8x256xf32> to vector<2x8xf32>
    %cst_10 = arith.constant dense<0.000000e+00> : vector<2x8xf32>
    %8 = vector.multi_reduction <add>, %4, %cst_10 [2] : vector<2x8x256xf32> to vector<2x8xf32>
    %cst_11 = arith.constant 3.906250e-03 : f32
    %9 = vector.broadcast %cst_11 : f32 to vector<2x8xf32>
    %10 = arith.mulf %8, %9 : vector<2x8xf32>
    %11 = vector.extract_strided_slice %7 {offsets = [0, 4], sizes = [2, 4], strides = [1, 1]} : vector<2x8xf32> to vector<2x4xf32>
    %12 = vector.shape_cast %11 : vector<2x4xf32> to vector<2x1x4xf32>
    %13 = vector.shape_cast %0 : vector<4x4xf32> to vector<1x4x4xf32>
    %14 = vector.broadcast %12 : vector<2x1x4xf32> to vector<2x4x4xf32>
    %15 = vector.broadcast %13 : vector<1x4x4xf32> to vector<2x4x4xf32>
    %16 = arith.mulf %14, %15 : vector<2x4x4xf32>
    %cst_12 = arith.constant dense<0.000000e+00> : vector<2x4xf32>
    %17 = vector.multi_reduction <add>, %16, %cst_12 [2] : vector<2x4x4xf32> to vector<2x4xf32>
    %cst_13 = arith.constant 0.000000e+00 : f32
    %18 = vector.broadcast %cst_13 : f32 to vector<2x4xf32>
    %19 = arith.maximumf %17, %18 : vector<2x4xf32>
    %20 = vector.shape_cast %19 : vector<2x4xf32> to vector<2x1x4xf32>
    %21 = vector.shape_cast %1 : vector<4x4xf32> to vector<1x4x4xf32>
    %22 = vector.broadcast %20 : vector<2x1x4xf32> to vector<2x4x4xf32>
    %23 = vector.broadcast %21 : vector<1x4x4xf32> to vector<2x4x4xf32>
    %24 = arith.mulf %22, %23 : vector<2x4x4xf32>
    %cst_14 = arith.constant dense<0.000000e+00> : vector<2x4xf32>
    %25 = vector.multi_reduction <add>, %24, %cst_14 [2] : vector<2x4x4xf32> to vector<2x4xf32>
    %26 = vector.extract_strided_slice %10 {offsets = [0, 4], sizes = [2, 4], strides = [1, 1]} : vector<2x8xf32> to vector<2x4xf32>
    %27 = vector.shape_cast %26 : vector<2x4xf32> to vector<2x1x4xf32>
    %28 = vector.shape_cast %0 : vector<4x4xf32> to vector<1x4x4xf32>
    %29 = vector.broadcast %27 : vector<2x1x4xf32> to vector<2x4x4xf32>
    %30 = vector.broadcast %28 : vector<1x4x4xf32> to vector<2x4x4xf32>
    %31 = arith.mulf %29, %30 : vector<2x4x4xf32>
    %cst_15 = arith.constant dense<0.000000e+00> : vector<2x4xf32>
    %32 = vector.multi_reduction <add>, %31, %cst_15 [2] : vector<2x4x4xf32> to vector<2x4xf32>
    %cst_16 = arith.constant 0.000000e+00 : f32
    %33 = vector.broadcast %cst_16 : f32 to vector<2x4xf32>
    %34 = arith.maximumf %32, %33 : vector<2x4xf32>
    %35 = vector.shape_cast %34 : vector<2x4xf32> to vector<2x1x4xf32>
    %36 = vector.shape_cast %1 : vector<4x4xf32> to vector<1x4x4xf32>
    %37 = vector.broadcast %35 : vector<2x1x4xf32> to vector<2x4x4xf32>
    %38 = vector.broadcast %36 : vector<1x4x4xf32> to vector<2x4x4xf32>
    %39 = arith.mulf %37, %38 : vector<2x4x4xf32>
    %cst_17 = arith.constant dense<0.000000e+00> : vector<2x4xf32>
    %40 = vector.multi_reduction <add>, %39, %cst_17 [2] : vector<2x4x4xf32> to vector<2x4xf32>
    %41 = arith.addf %25, %40 : vector<2x4xf32>
    %42 = arith.negf %41 : vector<2x4xf32>
    %43 = math.exp %42 : vector<2x4xf32>
    %cst_18 = arith.constant 1.000000e+00 : f32
    %44 = vector.broadcast %cst_18 : f32 to vector<2x4xf32>
    %45 = arith.addf %44, %43 : vector<2x4xf32>
    %46 = arith.divf %44, %45 : vector<2x4xf32>
    %cst_19 = arith.constant 0.000000e+00 : f32
    %47 = vector.broadcast %cst_19 : f32 to vector<2x4xf32>
    %48 = tpu.concatenate %47, %46 in 1 : vector<2x4xf32>, vector<2x4xf32> -> vector<2x8xf32>
    %49 = tpu.iota {dimensions = array<i32: 1>} : vector<1x8x256xi32>
    %c4_i32 = arith.constant 4 : i32
    %50 = vector.broadcast %c4_i32 : i32 to vector<1x8x256xi32>
    %51 = arith.cmpi slt, %49, %50 : vector<1x8x256xi32>
    %52 = vector.shape_cast %6 : vector<2x256xf32> to vector<2x1x256xf32>
    %53 = vector.shape_cast %48 : vector<2x8xf32> to vector<2x8x1xf32>
    %54 = vector.shape_cast %51 : vector<1x8x256xi1> to vector<1x8x256xi1>
    %55 = vector.broadcast %54 : vector<1x8x256xi1> to vector<2x8x256xi1>
    %56 = vector.shape_cast %52 : vector<2x1x256xf32> to vector<2x1x256xf32>
    %57 = vector.broadcast %56 : vector<2x1x256xf32> to vector<2x8x256xf32>
    %58 = vector.shape_cast %53 : vector<2x8x1xf32> to vector<2x8x1xf32>
    %59 = vector.broadcast %58 : vector<2x8x1xf32> to vector<2x8x256xf32>
    %60 = arith.select %55, %57, %59 : vector<2x8x256xi1>, vector<2x8x256xf32>
    %61 = arith.mulf %4, %60 : vector<2x8x256xf32>
    %c0_20 = arith.constant 0 : index
    %c0_21 = arith.constant 0 : index
    %c0_22 = arith.constant 0 : index
    %62 = tpu.strided_load %arg1[%c0_20, %c0_21, %c0_22] {strides = array<i32: 1, 2, 1>} : memref<1x32x256xf32, #tpu.memory_space<vmem>>, vector<1x16x256xf32>
    %63 = vector.shape_cast %62 : vector<1x16x256xf32> to vector<16x256xf32>
    %64 = vector.shape_cast %63 : vector<16x256xf32> to vector<2x8x256xf32>
    %65 = arith.addf %61, %64 : vector<2x8x256xf32>
    %c0_23 = arith.constant 0 : index
    %c0_24 = arith.constant 0 : index
    %c0_25 = arith.constant 0 : index
    %c0_26 = arith.constant 0 : index
    %66 = vector.load %arg5[%c0_23, %c0_24, %c0_25, %c0_26] : memref<1x2x8x512xf32, #tpu.memory_space<vmem>>, vector<1x2x8x256xf32>
    %67 = vector.shape_cast %66 : vector<1x2x8x256xf32> to vector<2x8x256xf32>
    %68 = vector.shape_cast %65 : vector<2x8x256xf32> to vector<1x2x8x256xf32>
    tpu.vector_store %arg5[%c0_23, %c0_24, %c0_25, %c0_26], %68 {strides = array<i32>} : memref<1x2x8x512xf32, #tpu.memory_space<vmem>>, vector<1x2x8x256xf32>,
    %c0_27 = arith.constant 0 : index
    %c16 = arith.constant 16 : index
    %c0_28 = arith.constant 0 : index
    %69 = vector.load %arg1[%c0_27, %c16, %c0_28] : memref<1x32x256xf32, #tpu.memory_space<vmem>>, vector<1x16x256xf32>
    %70 = vector.shape_cast %69 : vector<1x16x256xf32> to vector<16x256xf32>
    %71 = vector.shape_cast %70 : vector<16x256xf32> to vector<2x8x256xf32>
    %c0_29 = arith.constant 0 : index
    %c1 = arith.constant 1 : index
    %c0_30 = arith.constant 0 : index
    %c0_31 = arith.constant 0 : index
    %72 = vector.load %arg2[%c0_29, %c1, %c0_30, %c0_31] : memref<1x2x2x256xf32, #tpu.memory_space<vmem>>, vector<1x1x2x256xf32>
    %73 = vector.shape_cast %72 : vector<1x1x2x256xf32> to vector<2x256xf32>
    %cst_32 = arith.constant dense<0xFF800000> : vector<2x8xf32>
    %74 = vector.multi_reduction <maximumf>, %71, %cst_32 [2] : vector<2x8x256xf32> to vector<2x8xf32>
    %cst_33 = arith.constant dense<0.000000e+00> : vector<2x8xf32>
    %75 = vector.multi_reduction <add>, %71, %cst_33 [2] : vector<2x8x256xf32> to vector<2x8xf32>
    %cst_34 = arith.constant 3.906250e-03 : f32
    %76 = vector.broadcast %cst_34 : f32 to vector<2x8xf32>
    %77 = arith.mulf %75, %76 : vector<2x8xf32>
    %78 = vector.extract_strided_slice %74 {offsets = [0, 4], sizes = [2, 4], strides = [1, 1]} : vector<2x8xf32> to vector<2x4xf32>
    %79 = vector.shape_cast %78 : vector<2x4xf32> to vector<2x1x4xf32>
    %80 = vector.shape_cast %0 : vector<4x4xf32> to vector<1x4x4xf32>
    %81 = vector.broadcast %79 : vector<2x1x4xf32> to vector<2x4x4xf32>
    %82 = vector.broadcast %80 : vector<1x4x4xf32> to vector<2x4x4xf32>
    %83 = arith.mulf %81, %82 : vector<2x4x4xf32>
    %cst_35 = arith.constant dense<0.000000e+00> : vector<2x4xf32>
    %84 = vector.multi_reduction <add>, %83, %cst_35 [2] : vector<2x4x4xf32> to vector<2x4xf32>
    %cst_36 = arith.constant 0.000000e+00 : f32
    %85 = vector.broadcast %cst_36 : f32 to vector<2x4xf32>
    %86 = arith.maximumf %84, %85 : vector<2x4xf32>
    %87 = vector.shape_cast %86 : vector<2x4xf32> to vector<2x1x4xf32>
    %88 = vector.shape_cast %1 : vector<4x4xf32> to vector<1x4x4xf32>
    %89 = vector.broadcast %87 : vector<2x1x4xf32> to vector<2x4x4xf32>
    %90 = vector.broadcast %88 : vector<1x4x4xf32> to vector<2x4x4xf32>
    %91 = arith.mulf %89, %90 : vector<2x4x4xf32>
    %cst_37 = arith.constant dense<0.000000e+00> : vector<2x4xf32>
    %92 = vector.multi_reduction <add>, %91, %cst_37 [2] : vector<2x4x4xf32> to vector<2x4xf32>
    %93 = vector.extract_strided_slice %77 {offsets = [0, 4], sizes = [2, 4], strides = [1, 1]} : vector<2x8xf32> to vector<2x4xf32>
    %94 = vector.shape_cast %93 : vector<2x4xf32> to vector<2x1x4xf32>
    %95 = vector.shape_cast %0 : vector<4x4xf32> to vector<1x4x4xf32>
    %96 = vector.broadcast %94 : vector<2x1x4xf32> to vector<2x4x4xf32>
    %97 = vector.broadcast %95 : vector<1x4x4xf32> to vector<2x4x4xf32>
    %98 = arith.mulf %96, %97 : vector<2x4x4xf32>
    %cst_38 = arith.constant dense<0.000000e+00> : vector<2x4xf32>
    %99 = vector.multi_reduction <add>, %98, %cst_38 [2] : vector<2x4x4xf32> to vector<2x4xf32>
    %cst_39 = arith.constant 0.000000e+00 : f32
    %100 = vector.broadcast %cst_39 : f32 to vector<2x4xf32>
    %101 = arith.maximumf %99, %100 : vector<2x4xf32>
    %102 = vector.shape_cast %101 : vector<2x4xf32> to vector<2x1x4xf32>
    %103 = vector.shape_cast %1 : vector<4x4xf32> to vector<1x4x4xf32>
    %104 = vector.broadcast %102 : vector<2x1x4xf32> to vector<2x4x4xf32>
    %105 = vector.broadcast %103 : vector<1x4x4xf32> to vector<2x4x4xf32>
    %106 = arith.mulf %104, %105 : vector<2x4x4xf32>
    %cst_40 = arith.constant dense<0.000000e+00> : vector<2x4xf32>
    %107 = vector.multi_reduction <add>, %106, %cst_40 [2] : vector<2x4x4xf32> to vector<2x4xf32>
    %108 = arith.addf %92, %107 : vector<2x4xf32>
    %109 = arith.negf %108 : vector<2x4xf32>
    %110 = math.exp %109 : vector<2x4xf32>
    %cst_41 = arith.constant 1.000000e+00 : f32
    %111 = vector.broadcast %cst_41 : f32 to vector<2x4xf32>
    %112 = arith.addf %111, %110 : vector<2x4xf32>
    %113 = arith.divf %111, %112 : vector<2x4xf32>
    %cst_42 = arith.constant 0.000000e+00 : f32
    %114 = vector.broadcast %cst_42 : f32 to vector<2x4xf32>
    %115 = tpu.concatenate %114, %113 in 1 : vector<2x4xf32>, vector<2x4xf32> -> vector<2x8xf32>
    %116 = tpu.iota {dimensions = array<i32: 1>} : vector<1x8x256xi32>
    %c4_i32_43 = arith.constant 4 : i32
    %117 = vector.broadcast %c4_i32_43 : i32 to vector<1x8x256xi32>
    %118 = arith.cmpi slt, %116, %117 : vector<1x8x256xi32>
    %119 = vector.shape_cast %73 : vector<2x256xf32> to vector<2x1x256xf32>
    %120 = vector.shape_cast %115 : vector<2x8xf32> to vector<2x8x1xf32>
    %121 = vector.shape_cast %118 : vector<1x8x256xi1> to vector<1x8x256xi1>
    %122 = vector.broadcast %121 : vector<1x8x256xi1> to vector<2x8x256xi1>
    %123 = vector.shape_cast %119 : vector<2x1x256xf32> to vector<2x1x256xf32>
    %124 = vector.broadcast %123 : vector<2x1x256xf32> to vector<2x8x256xf32>
    %125 = vector.shape_cast %120 : vector<2x8x1xf32> to vector<2x8x1xf32>
    %126 = vector.broadcast %125 : vector<2x8x1xf32> to vector<2x8x256xf32>
    %127 = arith.select %122, %124, %126 : vector<2x8x256xi1>, vector<2x8x256xf32>
    %128 = arith.mulf %71, %127 : vector<2x8x256xf32>
    %c0_44 = arith.constant 0 : index
    %c1_45 = arith.constant 1 : index
    %c0_46 = arith.constant 0 : index
    %129 = tpu.strided_load %arg1[%c0_44, %c1_45, %c0_46] {strides = array<i32: 1, 2, 1>} : memref<1x32x256xf32, #tpu.memory_space<vmem>>, vector<1x16x256xf32>
    %130 = vector.shape_cast %129 : vector<1x16x256xf32> to vector<16x256xf32>
    %131 = vector.shape_cast %130 : vector<16x256xf32> to vector<2x8x256xf32>
    %132 = arith.addf %128, %131 : vector<2x8x256xf32>
    %c0_47 = arith.constant 0 : index
    %c0_48 = arith.constant 0 : index
    %c0_49 = arith.constant 0 : index
    %c256 = arith.constant 256 : index
    %133 = vector.load %arg5[%c0_47, %c0_48, %c0_49, %c256] : memref<1x2x8x512xf32, #tpu.memory_space<vmem>>, vector<1x2x8x256xf32>
    %134 = vector.shape_cast %133 : vector<1x2x8x256xf32> to vector<2x8x256xf32>
    %135 = vector.shape_cast %132 : vector<2x8x256xf32> to vector<1x2x8x256xf32>
    tpu.vector_store %arg5[%c0_47, %c0_48, %c0_49, %c256], %135 {strides = array<i32>} : memref<1x2x8x512xf32, #tpu.memory_space<vmem>>, vector<1x2x8x256xf32>,
    return
  }
  func.func @transform_0(%arg0: i32) -> (i32, i32, i32) {
    %c0_i32 = arith.constant 0 : i32
    %c0_i32_0 = arith.constant 0 : i32
    %c0_i32_1 = arith.constant 0 : i32
    return %arg0, %c0_i32, %c0_i32_0 : i32, i32, i32
  }
  func.func @transform_1(%arg0: i32) -> (i32, i32, i32, i32) {
    %c0_i32 = arith.constant 0 : i32
    %c0_i32_0 = arith.constant 0 : i32
    %c0_i32_1 = arith.constant 0 : i32
    %c0_i32_2 = arith.constant 0 : i32
    return %arg0, %c0_i32, %c0_i32_0, %c0_i32_1 : i32, i32, i32, i32
  }
  func.func @transform_2(%arg0: i32) -> (i32, i32) {
    %c0_i32 = arith.constant 0 : i32
    %c0_i32_0 = arith.constant 0 : i32
    %c0_i32_1 = arith.constant 0 : i32
    return %c0_i32, %c0_i32_0 : i32, i32
  }
  func.func @transform_3(%arg0: i32) -> (i32, i32) {
    %c0_i32 = arith.constant 0 : i32
    %c0_i32_0 = arith.constant 0 : i32
    %c0_i32_1 = arith.constant 0 : i32
    return %c0_i32, %c0_i32_0 : i32, i32
  }
  func.func @transform_4(%arg0: i32) -> (i32, i32, i32, i32) {
    %c0_i32 = arith.constant 0 : i32
    %c0_i32_0 = arith.constant 0 : i32
    %c0_i32_1 = arith.constant 0 : i32
    %c0_i32_2 = arith.constant 0 : i32
    return %arg0, %c0_i32, %c0_i32_0, %c0_i32_1 : i32, i32, i32, i32
  }
}

module attributes {stable_mosaic.version = 11 : i64} {
  func.func @_sda_blocked_kernel(%arg0: i32, %arg1: i32, %arg2: memref<1x2x2x8x256xf32, #tpu.memory_space<vmem>>, %arg3: memref<1x2x2x256xf32, #tpu.memory_space<vmem>>, %arg4: memref<1x2x8x512xf32, #tpu.memory_space<vmem>>, %arg5: memref<4x4xf32, #tpu.memory_space<vmem>>, %arg6: memref<4x4xf32, #tpu.memory_space<vmem>>, %arg7: memref<1x2x8x512xf32, #tpu.memory_space<vmem>>) attributes {dimension_semantics = [#tpu.dimension_semantics<parallel>, #tpu.dimension_semantics<parallel>], iteration_bounds = array<i64: 2, 1>, scalar_prefetch = 0 : i64, scratch_operands = 0 : i64, tpu.core_type = #tpu.core_type<tc>, window_params = [{transform_indices = @transform_0, window_bounds = array<i64: 1, 2, 2, 8, 256>}, {transform_indices = @transform_1, window_bounds = array<i64: 1, 2, 2, 256>}, {transform_indices = @transform_2, window_bounds = array<i64: 1, 2, 8, 512>}, {pipeline_mode = #tpu.pipeline_mode<synchronous>, transform_indices = @transform_3, window_bounds = array<i64: 4, 4>}, {pipeline_mode = #tpu.pipeline_mode<synchronous>, transform_indices = @transform_4, window_bounds = array<i64: 4, 4>}, {transform_indices = @transform_5, window_bounds = array<i64: 1, 2, 8, 512>}]} {
    %c0 = arith.constant 0 : index
    %c0_0 = arith.constant 0 : index
    %0 = vector.load %arg5[%c0, %c0_0] : memref<4x4xf32, #tpu.memory_space<vmem>>, vector<4x4xf32>
    %c0_1 = arith.constant 0 : index
    %c0_2 = arith.constant 0 : index
    %1 = vector.load %arg6[%c0_1, %c0_2] : memref<4x4xf32, #tpu.memory_space<vmem>>, vector<4x4xf32>
    %c2_i32 = arith.constant 2 : i32
    %2 = arith.muli %arg1, %c2_i32 : i32
    %3 = tpu.assume_multiple %2, 2 : i32
    %c0_3 = arith.constant 0 : index
    %c0_4 = arith.constant 0 : index
    %c0_5 = arith.constant 0 : index
    %c0_6 = arith.constant 0 : index
    %c0_7 = arith.constant 0 : index
    %4 = vector.load %arg2[%c0_3, %c0_4, %c0_5, %c0_6, %c0_7] : memref<1x2x2x8x256xf32, #tpu.memory_space<vmem>>, vector<1x1x2x8x256xf32>
    %5 = vector.shape_cast %4 : vector<1x1x2x8x256xf32> to vector<2x8x256xf32>
    %c0_8 = arith.constant 0 : index
    %c0_9 = arith.constant 0 : index
    %6 = arith.index_cast %3 : i32 to index
    %c0_10 = arith.constant 0 : index
    %7 = vector.load %arg3[%c0_8, %c0_9, %6, %c0_10] : memref<1x2x2x256xf32, #tpu.memory_space<vmem>>, vector<1x1x2x256xf32>
    %8 = vector.shape_cast %7 : vector<1x1x2x256xf32> to vector<2x256xf32>
    %cst = arith.constant dense<0xFF800000> : vector<2x8xf32>
    %9 = vector.multi_reduction <maximumf>, %5, %cst [2] : vector<2x8x256xf32> to vector<2x8xf32>
    %cst_11 = arith.constant dense<0.000000e+00> : vector<2x8xf32>
    %10 = vector.multi_reduction <add>, %5, %cst_11 [2] : vector<2x8x256xf32> to vector<2x8xf32>
    %cst_12 = arith.constant 3.906250e-03 : f32
    %11 = vector.broadcast %cst_12 : f32 to vector<2x8xf32>
    %12 = arith.mulf %10, %11 : vector<2x8xf32>
    %13 = vector.extract_strided_slice %9 {offsets = [0, 4], sizes = [2, 4], strides = [1, 1]} : vector<2x8xf32> to vector<2x4xf32>
    %14 = vector.shape_cast %13 : vector<2x4xf32> to vector<2x1x4xf32>
    %15 = vector.shape_cast %0 : vector<4x4xf32> to vector<1x4x4xf32>
    %16 = vector.broadcast %14 : vector<2x1x4xf32> to vector<2x4x4xf32>
    %17 = vector.broadcast %15 : vector<1x4x4xf32> to vector<2x4x4xf32>
    %18 = arith.mulf %16, %17 : vector<2x4x4xf32>
    %cst_13 = arith.constant dense<0.000000e+00> : vector<2x4xf32>
    %19 = vector.multi_reduction <add>, %18, %cst_13 [2] : vector<2x4x4xf32> to vector<2x4xf32>
    %cst_14 = arith.constant 0.000000e+00 : f32
    %20 = vector.broadcast %cst_14 : f32 to vector<2x4xf32>
    %21 = arith.maximumf %19, %20 : vector<2x4xf32>
    %22 = vector.shape_cast %21 : vector<2x4xf32> to vector<2x1x4xf32>
    %23 = vector.shape_cast %1 : vector<4x4xf32> to vector<1x4x4xf32>
    %24 = vector.broadcast %22 : vector<2x1x4xf32> to vector<2x4x4xf32>
    %25 = vector.broadcast %23 : vector<1x4x4xf32> to vector<2x4x4xf32>
    %26 = arith.mulf %24, %25 : vector<2x4x4xf32>
    %cst_15 = arith.constant dense<0.000000e+00> : vector<2x4xf32>
    %27 = vector.multi_reduction <add>, %26, %cst_15 [2] : vector<2x4x4xf32> to vector<2x4xf32>
    %28 = vector.extract_strided_slice %12 {offsets = [0, 4], sizes = [2, 4], strides = [1, 1]} : vector<2x8xf32> to vector<2x4xf32>
    %29 = vector.shape_cast %28 : vector<2x4xf32> to vector<2x1x4xf32>
    %30 = vector.shape_cast %0 : vector<4x4xf32> to vector<1x4x4xf32>
    %31 = vector.broadcast %29 : vector<2x1x4xf32> to vector<2x4x4xf32>
    %32 = vector.broadcast %30 : vector<1x4x4xf32> to vector<2x4x4xf32>
    %33 = arith.mulf %31, %32 : vector<2x4x4xf32>
    %cst_16 = arith.constant dense<0.000000e+00> : vector<2x4xf32>
    %34 = vector.multi_reduction <add>, %33, %cst_16 [2] : vector<2x4x4xf32> to vector<2x4xf32>
    %cst_17 = arith.constant 0.000000e+00 : f32
    %35 = vector.broadcast %cst_17 : f32 to vector<2x4xf32>
    %36 = arith.maximumf %34, %35 : vector<2x4xf32>
    %37 = vector.shape_cast %36 : vector<2x4xf32> to vector<2x1x4xf32>
    %38 = vector.shape_cast %1 : vector<4x4xf32> to vector<1x4x4xf32>
    %39 = vector.broadcast %37 : vector<2x1x4xf32> to vector<2x4x4xf32>
    %40 = vector.broadcast %38 : vector<1x4x4xf32> to vector<2x4x4xf32>
    %41 = arith.mulf %39, %40 : vector<2x4x4xf32>
    %cst_18 = arith.constant dense<0.000000e+00> : vector<2x4xf32>
    %42 = vector.multi_reduction <add>, %41, %cst_18 [2] : vector<2x4x4xf32> to vector<2x4xf32>
    %43 = arith.addf %27, %42 : vector<2x4xf32>
    %44 = arith.negf %43 : vector<2x4xf32>
    %45 = math.exp %44 : vector<2x4xf32>
    %cst_19 = arith.constant 1.000000e+00 : f32
    %46 = vector.broadcast %cst_19 : f32 to vector<2x4xf32>
    %47 = arith.addf %46, %45 : vector<2x4xf32>
    %48 = arith.divf %46, %47 : vector<2x4xf32>
    %cst_20 = arith.constant 0.000000e+00 : f32
    %49 = vector.broadcast %cst_20 : f32 to vector<2x4xf32>
    %50 = tpu.concatenate %49, %48 in 1 : vector<2x4xf32>, vector<2x4xf32> -> vector<2x8xf32>
    %51 = tpu.iota {dimensions = array<i32: 1>} : vector<1x8x256xi32>
    %c4_i32 = arith.constant 4 : i32
    %52 = vector.broadcast %c4_i32 : i32 to vector<1x8x256xi32>
    %53 = arith.cmpi slt, %51, %52 : vector<1x8x256xi32>
    %54 = vector.shape_cast %8 : vector<2x256xf32> to vector<2x1x256xf32>
    %55 = vector.shape_cast %50 : vector<2x8xf32> to vector<2x8x1xf32>
    %56 = vector.shape_cast %53 : vector<1x8x256xi1> to vector<1x8x256xi1>
    %57 = vector.broadcast %56 : vector<1x8x256xi1> to vector<2x8x256xi1>
    %58 = vector.shape_cast %54 : vector<2x1x256xf32> to vector<2x1x256xf32>
    %59 = vector.broadcast %58 : vector<2x1x256xf32> to vector<2x8x256xf32>
    %60 = vector.shape_cast %55 : vector<2x8x1xf32> to vector<2x8x1xf32>
    %61 = vector.broadcast %60 : vector<2x8x1xf32> to vector<2x8x256xf32>
    %62 = arith.select %57, %59, %61 : vector<2x8x256xi1>, vector<2x8x256xf32>
    %63 = arith.mulf %5, %62 : vector<2x8x256xf32>
    %c0_21 = arith.constant 0 : index
    %c0_22 = arith.constant 0 : index
    %c0_23 = arith.constant 0 : index
    %c0_24 = arith.constant 0 : index
    %64 = vector.load %arg4[%c0_21, %c0_22, %c0_23, %c0_24] : memref<1x2x8x512xf32, #tpu.memory_space<vmem>>, vector<1x2x8x256xf32>
    %65 = vector.shape_cast %64 : vector<1x2x8x256xf32> to vector<2x8x256xf32>
    %66 = arith.addf %63, %65 : vector<2x8x256xf32>
    %c0_25 = arith.constant 0 : index
    %c0_26 = arith.constant 0 : index
    %c0_27 = arith.constant 0 : index
    %c0_28 = arith.constant 0 : index
    %67 = vector.load %arg7[%c0_25, %c0_26, %c0_27, %c0_28] : memref<1x2x8x512xf32, #tpu.memory_space<vmem>>, vector<1x2x8x256xf32>
    %68 = vector.shape_cast %67 : vector<1x2x8x256xf32> to vector<2x8x256xf32>
    %69 = vector.shape_cast %66 : vector<2x8x256xf32> to vector<1x2x8x256xf32>
    tpu.vector_store %arg7[%c0_25, %c0_26, %c0_27, %c0_28], %69 {strides = array<i32>} : memref<1x2x8x512xf32, #tpu.memory_space<vmem>>, vector<1x2x8x256xf32>,
    %c0_29 = arith.constant 0 : index
    %c1 = arith.constant 1 : index
    %c0_30 = arith.constant 0 : index
    %c0_31 = arith.constant 0 : index
    %c0_32 = arith.constant 0 : index
    %70 = vector.load %arg2[%c0_29, %c1, %c0_30, %c0_31, %c0_32] : memref<1x2x2x8x256xf32, #tpu.memory_space<vmem>>, vector<1x1x2x8x256xf32>
    %71 = vector.shape_cast %70 : vector<1x1x2x8x256xf32> to vector<2x8x256xf32>
    %c0_33 = arith.constant 0 : index
    %c1_34 = arith.constant 1 : index
    %72 = arith.index_cast %3 : i32 to index
    %c0_35 = arith.constant 0 : index
    %73 = vector.load %arg3[%c0_33, %c1_34, %72, %c0_35] : memref<1x2x2x256xf32, #tpu.memory_space<vmem>>, vector<1x1x2x256xf32>
    %74 = vector.shape_cast %73 : vector<1x1x2x256xf32> to vector<2x256xf32>
    %cst_36 = arith.constant dense<0xFF800000> : vector<2x8xf32>
    %75 = vector.multi_reduction <maximumf>, %71, %cst_36 [2] : vector<2x8x256xf32> to vector<2x8xf32>
    %cst_37 = arith.constant dense<0.000000e+00> : vector<2x8xf32>
    %76 = vector.multi_reduction <add>, %71, %cst_37 [2] : vector<2x8x256xf32> to vector<2x8xf32>
    %cst_38 = arith.constant 3.906250e-03 : f32
    %77 = vector.broadcast %cst_38 : f32 to vector<2x8xf32>
    %78 = arith.mulf %76, %77 : vector<2x8xf32>
    %79 = vector.extract_strided_slice %75 {offsets = [0, 4], sizes = [2, 4], strides = [1, 1]} : vector<2x8xf32> to vector<2x4xf32>
    %80 = vector.shape_cast %79 : vector<2x4xf32> to vector<2x1x4xf32>
    %81 = vector.shape_cast %0 : vector<4x4xf32> to vector<1x4x4xf32>
    %82 = vector.broadcast %80 : vector<2x1x4xf32> to vector<2x4x4xf32>
    %83 = vector.broadcast %81 : vector<1x4x4xf32> to vector<2x4x4xf32>
    %84 = arith.mulf %82, %83 : vector<2x4x4xf32>
    %cst_39 = arith.constant dense<0.000000e+00> : vector<2x4xf32>
    %85 = vector.multi_reduction <add>, %84, %cst_39 [2] : vector<2x4x4xf32> to vector<2x4xf32>
    %cst_40 = arith.constant 0.000000e+00 : f32
    %86 = vector.broadcast %cst_40 : f32 to vector<2x4xf32>
    %87 = arith.maximumf %85, %86 : vector<2x4xf32>
    %88 = vector.shape_cast %87 : vector<2x4xf32> to vector<2x1x4xf32>
    %89 = vector.shape_cast %1 : vector<4x4xf32> to vector<1x4x4xf32>
    %90 = vector.broadcast %88 : vector<2x1x4xf32> to vector<2x4x4xf32>
    %91 = vector.broadcast %89 : vector<1x4x4xf32> to vector<2x4x4xf32>
    %92 = arith.mulf %90, %91 : vector<2x4x4xf32>
    %cst_41 = arith.constant dense<0.000000e+00> : vector<2x4xf32>
    %93 = vector.multi_reduction <add>, %92, %cst_41 [2] : vector<2x4x4xf32> to vector<2x4xf32>
    %94 = vector.extract_strided_slice %78 {offsets = [0, 4], sizes = [2, 4], strides = [1, 1]} : vector<2x8xf32> to vector<2x4xf32>
    %95 = vector.shape_cast %94 : vector<2x4xf32> to vector<2x1x4xf32>
    %96 = vector.shape_cast %0 : vector<4x4xf32> to vector<1x4x4xf32>
    %97 = vector.broadcast %95 : vector<2x1x4xf32> to vector<2x4x4xf32>
    %98 = vector.broadcast %96 : vector<1x4x4xf32> to vector<2x4x4xf32>
    %99 = arith.mulf %97, %98 : vector<2x4x4xf32>
    %cst_42 = arith.constant dense<0.000000e+00> : vector<2x4xf32>
    %100 = vector.multi_reduction <add>, %99, %cst_42 [2] : vector<2x4x4xf32> to vector<2x4xf32>
    %cst_43 = arith.constant 0.000000e+00 : f32
    %101 = vector.broadcast %cst_43 : f32 to vector<2x4xf32>
    %102 = arith.maximumf %100, %101 : vector<2x4xf32>
    %103 = vector.shape_cast %102 : vector<2x4xf32> to vector<2x1x4xf32>
    %104 = vector.shape_cast %1 : vector<4x4xf32> to vector<1x4x4xf32>
    %105 = vector.broadcast %103 : vector<2x1x4xf32> to vector<2x4x4xf32>
    %106 = vector.broadcast %104 : vector<1x4x4xf32> to vector<2x4x4xf32>
    %107 = arith.mulf %105, %106 : vector<2x4x4xf32>
    %cst_44 = arith.constant dense<0.000000e+00> : vector<2x4xf32>
    %108 = vector.multi_reduction <add>, %107, %cst_44 [2] : vector<2x4x4xf32> to vector<2x4xf32>
    %109 = arith.addf %93, %108 : vector<2x4xf32>
    %110 = arith.negf %109 : vector<2x4xf32>
    %111 = math.exp %110 : vector<2x4xf32>
    %cst_45 = arith.constant 1.000000e+00 : f32
    %112 = vector.broadcast %cst_45 : f32 to vector<2x4xf32>
    %113 = arith.addf %112, %111 : vector<2x4xf32>
    %114 = arith.divf %112, %113 : vector<2x4xf32>
    %cst_46 = arith.constant 0.000000e+00 : f32
    %115 = vector.broadcast %cst_46 : f32 to vector<2x4xf32>
    %116 = tpu.concatenate %115, %114 in 1 : vector<2x4xf32>, vector<2x4xf32> -> vector<2x8xf32>
    %117 = tpu.iota {dimensions = array<i32: 1>} : vector<1x8x256xi32>
    %c4_i32_47 = arith.constant 4 : i32
    %118 = vector.broadcast %c4_i32_47 : i32 to vector<1x8x256xi32>
    %119 = arith.cmpi slt, %117, %118 : vector<1x8x256xi32>
    %120 = vector.shape_cast %74 : vector<2x256xf32> to vector<2x1x256xf32>
    %121 = vector.shape_cast %116 : vector<2x8xf32> to vector<2x8x1xf32>
    %122 = vector.shape_cast %119 : vector<1x8x256xi1> to vector<1x8x256xi1>
    %123 = vector.broadcast %122 : vector<1x8x256xi1> to vector<2x8x256xi1>
    %124 = vector.shape_cast %120 : vector<2x1x256xf32> to vector<2x1x256xf32>
    %125 = vector.broadcast %124 : vector<2x1x256xf32> to vector<2x8x256xf32>
    %126 = vector.shape_cast %121 : vector<2x8x1xf32> to vector<2x8x1xf32>
    %127 = vector.broadcast %126 : vector<2x8x1xf32> to vector<2x8x256xf32>
    %128 = arith.select %123, %125, %127 : vector<2x8x256xi1>, vector<2x8x256xf32>
    %129 = arith.mulf %71, %128 : vector<2x8x256xf32>
    %c0_48 = arith.constant 0 : index
    %c0_49 = arith.constant 0 : index
    %c0_50 = arith.constant 0 : index
    %c256 = arith.constant 256 : index
    %130 = vector.load %arg4[%c0_48, %c0_49, %c0_50, %c256] : memref<1x2x8x512xf32, #tpu.memory_space<vmem>>, vector<1x2x8x256xf32>
    %131 = vector.shape_cast %130 : vector<1x2x8x256xf32> to vector<2x8x256xf32>
    %132 = arith.addf %129, %131 : vector<2x8x256xf32>
    %c0_51 = arith.constant 0 : index
    %c0_52 = arith.constant 0 : index
    %c0_53 = arith.constant 0 : index
    %c256_54 = arith.constant 256 : index
    %133 = vector.load %arg7[%c0_51, %c0_52, %c0_53, %c256_54] : memref<1x2x8x512xf32, #tpu.memory_space<vmem>>, vector<1x2x8x256xf32>
    %134 = vector.shape_cast %133 : vector<1x2x8x256xf32> to vector<2x8x256xf32>
    %135 = vector.shape_cast %132 : vector<2x8x256xf32> to vector<1x2x8x256xf32>
    tpu.vector_store %arg7[%c0_51, %c0_52, %c0_53, %c256_54], %135 {strides = array<i32>} : memref<1x2x8x512xf32, #tpu.memory_space<vmem>>, vector<1x2x8x256xf32>,
    return
  }
  func.func @transform_0(%arg0: i32, %arg1: i32) -> (i32, i32, i32, i32, i32) {
    %c0_i32 = arith.constant 0 : i32
    %c0_i32_0 = arith.constant 0 : i32
    %c0_i32_1 = arith.constant 0 : i32
    %c0_i32_2 = arith.constant 0 : i32
    return %arg0, %c0_i32, %arg1, %c0_i32_0, %c0_i32_1 : i32, i32, i32, i32, i32
  }
  func.func @transform_1(%arg0: i32, %arg1: i32) -> (i32, i32, i32, i32) {
    %c0_i32 = arith.constant 0 : i32
    %c0_i32_0 = arith.constant 0 : i32
    %c0_i32_1 = arith.constant 0 : i32
    %c0_i32_2 = arith.constant 0 : i32
    return %arg0, %c0_i32, %c0_i32_0, %c0_i32_1 : i32, i32, i32, i32
  }
  func.func @transform_2(%arg0: i32, %arg1: i32) -> (i32, i32, i32, i32) {
    %c0_i32 = arith.constant 0 : i32
    %c0_i32_0 = arith.constant 0 : i32
    %c0_i32_1 = arith.constant 0 : i32
    return %arg0, %arg1, %c0_i32, %c0_i32_0 : i32, i32, i32, i32
  }
  func.func @transform_3(%arg0: i32, %arg1: i32) -> (i32, i32) {
    %c0_i32 = arith.constant 0 : i32
    %c0_i32_0 = arith.constant 0 : i32
    %c0_i32_1 = arith.constant 0 : i32
    return %c0_i32, %c0_i32_0 : i32, i32
  }
  func.func @transform_4(%arg0: i32, %arg1: i32) -> (i32, i32) {
    %c0_i32 = arith.constant 0 : i32
    %c0_i32_0 = arith.constant 0 : i32
    %c0_i32_1 = arith.constant 0 : i32
    return %c0_i32, %c0_i32_0 : i32, i32
  }
  func.func @transform_5(%arg0: i32, %arg1: i32) -> (i32, i32, i32, i32) {
    %c0_i32 = arith.constant 0 : i32
    %c0_i32_0 = arith.constant 0 : i32
    %c0_i32_1 = arith.constant 0 : i32
    return %arg0, %arg1, %c0_i32, %c0_i32_0 : i32, i32, i32, i32
  }
}

</mosaic_0001>

<bundles_post_ra>
// kernel: shuffle_dual_attention.1
= control target key start
LH: loop header
LB: loop body
LE: loop exit
PB: predicated region body
PF: predicated region fallthrough
CT: control target
= control target key end

     0   :  { %s1603_s18 = smov 0   ;;  %s1605_s19 = smov 0   ;;  %s1979_s0 = inlined_call_operand.vmem [shape: f32[2,2,2,8,256], index: 0, kind: input, shape index: {}]   ;;  %s1980_s1 = inlined_call_operand.vmem [shape: f32[2,2,2,256], index: 1, kind: input, shape index: {}]   ;;  %s1981_s2 = inlined_call_operand.vmem [shape: f32[2,2,8,512], index: 2, kind: input, shape index: {}]   ;;  %s1982_s3 = inlined_call_operand.vmem [shape: f32[4,4], index: 3, kind: input, shape index: {}]   ;;  %s1983_s4 = inlined_call_operand.vmem [shape: f32[4,4], index: 4, kind: input, shape index: {}]   ;;  %s1984_s5 = inlined_call_operand.vmem [shape: f32[2,2,8,512], index: 5, kind: output, shape index: {}]  }
   0x1   :  { %s1607_s20 = smov 0  }
   0x2 LB: > { %s27_s21 = sadd.s32 1, %s1566_s19  ;;  %p1477_p0 = scmp.ge.s32.totalorder %s1570_s20, 1  ;;  %s1570_s20 = sphi %s1607_s20, %s15_s20   ;;  %s1566_s19 = sphi %s1605_s19, %s1986_s19   ;;  %s1562_s18 = sphi %s1603_s18, %s1985_s18  }
   0x3   : > { %p29_p1 = scmp.ge.s32.totalorder %s27_s21, 2  ;;  %p237_p2 = scmp.lt.s32.totalorder %s1570_s20, 3 }
   0x5   : > { %s1988_s21 = smov (%p29_p1, %s27_s21), 0  ;;  %p238_p3 = pnand %p1477_p0, %p237_p2 }
   0x6   : > { %p291_p4 = scmp.lt.s32.totalorder (!%p238_p3), %s1562_s18, 1  ;;  %v356_v8 = vlaneseq (!%p238_p3)  ;;  %v328_v11 = vld [vmem:[%s1982_s3] sm:$0xf] (!%p238_p3)  ;;  %v1572_v18 = vmov (!%p238_p3), 0   ;;  %vm467_vm0 = vcmask (!%p238_p3), 1041409   ;;  %vm469_vm1 = vcmask (!%p238_p3), 1042434  }
   0x7   : > { %241 = sbr.rel (%p238_p3) target bundleno = 1046 (0x416), region = 40  ;;  %1529 = vset.pattern.permute.xlu1 (!%p238_p3), %v1572_v18  ;;  %1528 = vset.pattern.permute.xlu0 (!%p238_p3), %v1572_v18  ;;  %v329_v19 = vld [vmem:[%s1983_s4] sm:$0xf] (!%p238_p3)  ;;  %vm471_vm2 = vcmask (!%p238_p3), 1043459   ;;  %vm478_vm3 = vcmask (!%p238_p3), 27648   ;;  %vm807_vm4 = vcmask (!%p238_p3), 31744  }
   0x8   : > { %v1645_v9 = vshrl.u32 (!%p238_p3), %v356_v8, 7 }
   0xa   : > { %v1648_v10 = vsub.s32 (!%p238_p3), 1, %v1645_v9  ;;  %v374_v13 = vsub.s32 (!%p238_p3), 2, %v1645_v9  ;;  %v1656_v14 = vsub.s32 (!%p238_p3), 0, %v1645_v9  ;;  %v382_v16 = vsub.s32 (!%p238_p3), 3, %v1645_v9 }
   0xb   : > { %vm811_vm5 = vcmp.lt.s32.totalorder (!%p238_p3), %v1645_v9, 4 }
   0xc   : > { %v367_v12 = vrot.slane (!%p238_p3), %v328_v11, %v1648_v10  ;;  %v375_v15 = vrot.slane (!%p238_p3), %v328_v11, %v374_v13  ;;  %v359_v17 = vrot.slane (!%p238_p3), %v328_v11, %v1656_v14  ;;  %v383_v20 = vrot.slane (!%p238_p3), %v328_v11, %v382_v16 }
   0xd   : > { %v491_v21 = vrot.slane (!%p238_p3), %v329_v19, %v1656_v14  ;;  %v498_v22 = vrot.slane (!%p238_p3), %v329_v19, %v1648_v10  ;;  %v512_v23 = vrot.slane (!%p238_p3), %v329_v19, %v382_v16  ;;  %v505_v24 = vrot.slane (!%p238_p3), %v329_v19, %v374_v13 }
   0xe   : > { %s1990_s18 = smov (!%p291_p4, %s1562_s18), 1 }
   0xf   : > { %s1624_s22 = sshll.u32 %s1990_s18, 6  ;;  %s1500_s30 = sshll.u32 %s1990_s18, 3 }
  0x10   : > { %s1630_s25 = scalar_lea.vmem %s1979_s0, %s1624_s22  ;;  %s305_s8 = scalar_lea.vmem %s1980_s1, %s1500_s30 }
  0x11   : > { %v331_v0 = vld [vmem:[%s1630_s25] sm:$0xff]  ;;  %v332_v1 = vld [vmem:[%s1630_s25 + $0x8] sm:$0xff]  ;;  %v1635_v2 = vld [vmem:[%s1630_s25 + $0x10] sm:$0xff]  ;;  %s1923_s11 = scalar_lea.vmem %s1981_s2, %s1624_s22  ;;  %s326_s14 = scalar_lea.vmem %s1984_s5, %s1624_s22 }
  0x12   : > { %v347_v3 = vadd.f32 %v332_v1, %v331_v0  ;;  %v341_v4 = vmax.f32 %v331_v0, %v332_v1  ;;  %v1638_v5 = vld [vmem:[%s1630_s25 + $0x18] sm:$0xff]  ;;  %v1666_v25 = vld [vmem:[%s1630_s25 + $0x20] sm:$0xff]  ;;  %v1669_v26 = vld [vmem:[%s1630_s25 + $0x28] sm:$0xff] }
  0x13   : > { %v350_v6 = vadd.f32 %v1638_v5, %v1635_v2  ;;  %v344_v7 = vmax.f32 %v1635_v2, %v1638_v5  ;;  %v892_v27 = vadd.f32 %v1669_v26, %v1666_v25  ;;  %v1674_v28 = vld [vmem:[%s1630_s25 + $0x30] sm:$0xff]  ;;  %v1677_v29 = vld [vmem:[%s1630_s25 + $0x38] sm:$0xff]  ;;  %v886_v32 = vmax.f32 %v1666_v25, %v1669_v26 }
  0x14   : > { %348 = vadd.xlane.f32.xlu1 %v347_v3  ;;  %342 = vmax.xlane.f32.xlu0 %v341_v4  ;;  %v895_v30 = vadd.f32 %v1677_v29, %v1674_v28  ;;  %v889_v31 = vmax.f32 %v1674_v28, %v1677_v29 }
  0x18   : > { %351 = vadd.xlane.f32.xlu1 %v350_v6  ;;  %345 = vmax.xlane.f32.xlu0 %v344_v7 }
  0x29   : > { %370 = vbcast.lane.b32.xlu1 %v367_v12, 508 }
  0x2d   : > { %378 = vbcast.lane.b32.xlu1 %v375_v15, 508 }
  0x2e   : > { %362 = vbcast.lane.b32.xlu0 %v359_v17, 508 }
  0x31   : > { %386 = vbcast.lane.b32.xlu1 %v383_v20, 508 }
  0x32   : > { %493 = vbcast.lane.b32.xlu0 %v491_v21, 256 }
  0x35   : > { %500 = vbcast.lane.b32.xlu1 %v498_v22, 256 }
  0x36   : > { %514 = vbcast.lane.b32.xlu0 %v512_v23, 256 }
  0x39   : > { %507 = vbcast.lane.b32.xlu1 %v505_v24, 256 }
  0x55   : > { %893 = vadd.xlane.f32.xlu0 %v892_v27  ;;  %v1732_v27 = vand.u32 127, %v356_v8 }
  0x59   : > { %896 = vadd.xlane.f32.xlu0 %v895_v30 }
  0x5d   : > { %890 = vmax.xlane.f32.xlu1 %v889_v31  ;;  %887 = vmax.xlane.f32.xlu0 %v886_v32  ;;  %v434_v31 = vadd.s32 4, %v1732_v27 }
  0xa1   : > { %v349_v33 = vpop.xlane.xlu1 %348  ;;  %v343_v34 = vpop.xlane.xlu0 %342 }
  0xa2   : > { %v353_v46 = vmul.f32 0.00390625, %v349_v33 }
  0xa5   : > { %v352_v35 = vpop.xlane.xlu1 %351  ;;  %v346_v36 = vpop.xlane.xlu0 %345 }
  0xa6   : > { %v354_v52 = vmul.f32 0.00390625, %v352_v35 }
  0xa9   : > { %v1685_v37 = vpop.permute.xlu1 %370  ;;  %v1687_v38 = vpop.permute.xlu0 %362 }
  0xaa   : > { %v393_v39 = vmul.f32 %v1685_v37, %v343_v34  ;;  %v392_v40 = vmul.f32 %v1687_v38, %v343_v34  ;;  %v396_v44 = vmul.f32 %v1687_v38, %v346_v36  ;;  %v397_v48 = vmul.f32 %v1685_v37, %v346_v36 }
  0xab   : > { %v606_v49 = vmul.f32 %v1687_v38, %v353_v46  ;;  %v610_v54 = vmul.f32 %v1687_v38, %v354_v52  ;;  %v607_v11 = vmul.f32 %v1685_v37, %v353_v46  ;;  %v611_v12 = vmul.f32 %v1685_v37, %v354_v52 }
  0xac   : > { %412 = vperm.xlu1 %1529, %v393_v39   ;;  %409 = vperm.xlu0 %1528, %v392_v40  }
  0xad   : > { %v1691_v41 = vpop.permute.xlu1 %378  ;;  %v1706_v56 = vpop.permute.xlu0 %493 }
  0xae   : > { %v394_v42 = vmul.f32 %v1691_v41, %v343_v34  ;;  %v398_v47 = vmul.f32 %v1691_v41, %v346_v36  ;;  %v608_v51 = vmul.f32 %v1691_v41, %v353_v46  ;;  %v612_v55 = vmul.f32 %v1691_v41, %v354_v52 }
  0xb0   : > { %415 = vperm.xlu1 %1529, %v394_v42  }
  0xb1   : > { %v1694_v43 = vpop.permute.xlu1 %386  ;;  %v1708_v57 = vpop.permute.xlu0 %514 }
  0xb2   : > { %v395_v45 = vmul.f32 %v1694_v43, %v343_v34  ;;  %v399_v50 = vmul.f32 %v1694_v43, %v346_v36  ;;  %v609_v53 = vmul.f32 %v1694_v43, %v353_v46  ;;  %v613_v13 = vmul.f32 %v1694_v43, %v354_v52 }
  0xb3   : > { %v1738_v34 = vsub.s32 %v434_v31, %v1645_v9 }
  0xb4   : > { %421 = vperm.xlu1 %1529, %v396_v44   ;;  %418 = vperm.xlu0 %1528, %v395_v45  }
  0xb5   : > { %v1710_v58 = vpop.permute.xlu1 %500 }
  0xb8   : > { %427 = vperm.xlu1 %1529, %v398_v47   ;;  %424 = vperm.xlu0 %1528, %v397_v48  }
  0xb9   : > { %v1712_v60 = vpop.permute.xlu1 %507 }
  0xbc   : > { %623 = vperm.xlu1 %1529, %v606_v49   ;;  %430 = vperm.xlu0 %1528, %v399_v50  }
  0xc0   : > { %629 = vperm.xlu1 %1529, %v608_v51  }
  0xc4   : > { %632 = vperm.xlu1 %1529, %v609_v53  }
  0xc8   : > { %635 = vperm.xlu1 %1529, %v610_v54  }
  0xcc   : > { %641 = vperm.xlu1 %1529, %v612_v55  }
  0xe2   : > { %v894_v59 = vpop.xlane.xlu0 %893 }
  0xe3   : > { %v898_v15 = vmul.f32 0.00390625, %v894_v59 }
  0xe5   : > { %v1074_v17 = vmul.f32 %v898_v15, %v1687_v38  ;;  %v1075_v18 = vmul.f32 %v898_v15, %v1685_v37  ;;  %v1076_v22 = vmul.f32 %v898_v15, %v1691_v41  ;;  %v1077_v33 = vmul.f32 %v898_v15, %v1694_v43 }
  0xe6   : > { %v897_v61 = vpop.xlane.xlu0 %896 }
  0xe7   : > { %v899_v0 = vmul.f32 0.00390625, %v897_v61 }
  0xe9   : > { %v1081_v4 = vmul.f32 %v899_v0, %v1694_v43  ;;  %v1078_v19 = vmul.f32 %v899_v0, %v1687_v38  ;;  %v1079_v20 = vmul.f32 %v899_v0, %v1685_v37  ;;  %v1080_v23 = vmul.f32 %v899_v0, %v1691_v41 }
  0xea   : > { %v891_v62 = vpop.xlane.xlu1 %890  ;;  %v888_v63 = vpop.xlane.xlu0 %887 }
  0xeb   : > { %v906_v1 = vmul.f32 %v891_v62, %v1691_v41  ;;  %v900_v3 = vmul.f32 %v888_v63, %v1687_v38  ;;  %v901_v6 = vmul.f32 %v888_v63, %v1685_v37  ;;  %v904_v7 = vmul.f32 %v891_v62, %v1687_v38 }
  0xec   : > { %v905_v16 = vmul.f32 %v891_v62, %v1685_v37  ;;  %v902_v21 = vmul.f32 %v888_v63, %v1691_v41  ;;  %v903_v24 = vmul.f32 %v888_v63, %v1694_v43  ;;  %v907_v30 = vmul.f32 %v891_v62, %v1694_v43 }
  0xed   : > { %935 = vperm.xlu1 %1529, %v906_v1   ;;  %917 = vperm.xlu0 %1528, %v900_v3  }
  0xf1   : > { %1112 = vperm.xlu1 %1529, %v1081_v4   ;;  %920 = vperm.xlu0 %1528, %v901_v6  }
  0xf5   : > { %929 = vperm.xlu0 %1528, %v904_v7  }
  0xf9   : > { %626 = vperm.xlu0 %1528, %v607_v11  }
  0xfd   : > { %638 = vperm.xlu0 %1528, %v611_v12  }
 0x101   : > { %644 = vperm.xlu0 %1528, %v613_v13  }
 0x105   : > { %932 = vperm.xlu0 %1528, %v905_v16  }
 0x109   : > { %1091 = vperm.xlu0 %1528, %v1074_v17  }
 0x10d   : > { %1094 = vperm.xlu0 %1528, %v1075_v18  }
 0x111   : > { %1103 = vperm.xlu0 %1528, %v1078_v19  }
 0x115   : > { %1106 = vperm.xlu0 %1528, %v1079_v20  }
 0x119   : > { %923 = vperm.xlu0 %1528, %v902_v21  }
 0x11d   : > { %1097 = vperm.xlu0 %1528, %v1076_v22  }
 0x121   : > { %1109 = vperm.xlu0 %1528, %v1080_v23  }
 0x125   : > { %926 = vperm.xlu0 %1528, %v903_v24  }
 0x129   : > { %938 = vperm.xlu0 %1528, %v907_v30  }
 0x12b   : > { %v413_v32 = vpop.permute.xlu1 %412  ;;  %v410_v35 = vpop.permute.xlu0 %409 }
 0x12c   : > { %v442_v37 = vrot.slane %v413_v32, %v1738_v34  ;;  %v438_v8 = vrot.slane %v410_v35, %v1738_v34 }
 0x12d   : > { %1100 = vperm.xlu0 %1528, %v1077_v33  }
 0x12e   : > { %v468_v40 = vsel %vm467_vm0, %v442_v37, %v438_v8 }
 0x12f   : > { %v416_v36 = vpop.permute.xlu1 %415 }
 0x130   : > { %v446_v38 = vrot.slane %v416_v36, %v1738_v34 }
 0x132   : > { %v470_v42 = vsel %vm469_vm1, %v446_v38, %v468_v40 }
 0x133   : > { %v419_v39 = vpop.permute.xlu0 %418  ;;  %v422_v45 = vpop.permute.xlu1 %421 }
 0x134   : > { %v450_v41 = vrot.slane %v419_v39, %v1738_v34  ;;  %v454_v50 = vrot.slane %v422_v45, %v1738_v34 }
 0x136   : > { %v472_v43 = vsel %vm471_vm2, %v450_v41, %v470_v42 }
 0x137   : > { %v479_v44 = vsel %vm478_vm3, %v472_v43, 0.0  ;;  %v425_v46 = vpop.permute.xlu0 %424  ;;  %v428_v47 = vpop.permute.xlu1 %427 }
 0x138   : > { %480 = vadd.xlane.f32.xlu1 %v479_v44  ;;  %v458_v48 = vrot.slane %v425_v46, %v1738_v34  ;;  %v462_v51 = vrot.slane %v428_v47, %v1738_v34 }
 0x13a   : > { %v473_v52 = vsel %vm467_vm0, %v458_v48, %v454_v50 }
 0x13b   : > { %v431_v49 = vpop.permute.xlu0 %430  ;;  %v474_v54 = vsel %vm469_vm1, %v462_v51, %v473_v52  ;;  %v624_v6 = vpop.permute.xlu1 %623 }
 0x13c   : > { %v466_v53 = vrot.slane %v431_v49, %v1738_v34  ;;  %v649_v23 = vrot.slane %v624_v6, %v1738_v34 }
 0x13e   : > { %v475_v55 = vsel %vm471_vm2, %v466_v53, %v474_v54 }
 0x13f   : > { %v482_v59 = vsel %vm478_vm3, %v475_v55, 0.0  ;;  %v630_v11 = vpop.permute.xlu1 %629 }
 0x140   : > { %v657_v36 = vrot.slane %v630_v11, %v1738_v34 }
 0x143   : > { %v633_v15 = vpop.permute.xlu1 %632 }
 0x144   : > { %v661_v46 = vrot.slane %v633_v15, %v1738_v34 }
 0x147   : > { %v636_v17 = vpop.permute.xlu1 %635 }
 0x148   : > { %v665_v42 = vrot.slane %v636_v17, %v1738_v34 }
 0x14b   : > { %v642_v20 = vpop.permute.xlu1 %641 }
 0x14c   : > { %483 = vadd.xlane.f32.xlu0 %v482_v59  ;;  %v673_v59 = vrot.slane %v642_v20, %v1738_v34 }
 0x16c   : > { %v918_v61 = vpop.permute.xlu0 %917  ;;  %v936_v30 = vpop.permute.xlu1 %935 }
 0x16d   : > { %v943_v32 = vrot.slane %v918_v61, %v1738_v34  ;;  %v967_v50 = vrot.slane %v936_v30, %v1738_v34 }
 0x170   : > { %v921_v62 = vpop.permute.xlu0 %920  ;;  %v1113_v51 = vpop.permute.xlu1 %1112 }
 0x171   : > { %v947_v24 = vrot.slane %v921_v62, %v1738_v34 }
 0x173   : > { %v972_v38 = vsel %vm467_vm0, %v947_v24, %v943_v32 }
 0x174   : > { %v930_v63 = vpop.permute.xlu0 %929 }
 0x175   : > { %v959_v39 = vrot.slane %v930_v63, %v1738_v34 }
 0x178   : > { %v627_v0 = vpop.permute.xlu0 %626 }
 0x179   : > { %v653_v21 = vrot.slane %v627_v0, %v1738_v34 }
 0x17b   : > { %v678_v33 = vsel %vm467_vm0, %v653_v21, %v649_v23 }
 0x17c   : > { %v639_v1 = vpop.permute.xlu0 %638  ;;  %v679_v45 = vsel %vm469_vm1, %v657_v36, %v678_v33 }
 0x17d   : > { %v669_v37 = vrot.slane %v639_v1, %v1738_v34  ;;  %v680_v63 = vsel %vm471_vm2, %v661_v46, %v679_v45 }
 0x17f   : > { %v681_v52 = vsel %vm467_vm0, %v669_v37, %v665_v42 }
 0x180   : > { %v645_v3 = vpop.permute.xlu0 %644  ;;  %v682_v11 = vsel %vm469_vm1, %v673_v59, %v681_v52 }
 0x181   : > { %v677_v53 = vrot.slane %v645_v3, %v1738_v34 }
 0x184   : > { %v933_v4 = vpop.permute.xlu0 %932 }
 0x185   : > { %v963_v35 = vrot.slane %v933_v4, %v1738_v34  ;;  %v1145_v4 = vrot.slane %v1113_v51, %v1738_v34 }
 0x187   : > { %v975_v47 = vsel %vm467_vm0, %v963_v35, %v959_v39 }
 0x188   : > { %v1756_v7 = vpop.permute.xlu0 %1091  ;;  %v976_v0 = vsel %vm469_vm1, %v967_v50, %v975_v47 }
 0x189   : > { %v1117_v20 = vrot.slane %v1756_v7, %v1738_v34 }
 0x18c   : > { %v1095_v12 = vpop.permute.xlu0 %1094 }
 0x18d   : > { %v1121_v3 = vrot.slane %v1095_v12, %v1738_v34 }
 0x190   : > { %v1104_v13 = vpop.permute.xlu0 %1103 }
 0x191   : > { %v1133_v48 = vrot.slane %v1104_v13, %v1738_v34 }
 0x194   : > { %v1107_v16 = vpop.permute.xlu0 %1106 }
 0x195   : > { %v1137_v40 = vrot.slane %v1107_v16, %v1738_v34  ;;  %v686_v16 = vsel %vm478_vm3, %v680_v63, 0.0 }
 0x197   : > { %v1149_v61 = vsel %vm467_vm0, %v1137_v40, %v1133_v48 }
 0x198   : > { %v924_v18 = vpop.permute.xlu0 %923 }
 0x199   : > { %v951_v31 = vrot.slane %v924_v18, %v1738_v34  ;;  %v683_v18 = vsel %vm471_vm2, %v677_v53, %v682_v11 }
 0x19a   : > { %v689_v23 = vsel %vm478_vm3, %v683_v18, 0.0 }
 0x19b   : > { %v973_v44 = vsel %vm469_vm1, %v951_v31, %v972_v38 }
 0x19c   : > { %v1098_v19 = vpop.permute.xlu0 %1097 }
 0x19d   : > { %v1125_v13 = vrot.slane %v1098_v19, %v1738_v34 }
 0x1a0   : > { %v1110_v22 = vpop.permute.xlu0 %1109 }
 0x1a1   : > { %v1141_v43 = vrot.slane %v1110_v22, %v1738_v34  ;;  %v1146_v22 = vsel %vm467_vm0, %v1121_v3, %v1117_v20 }
 0x1a2   : > { %v1147_v24 = vsel %vm469_vm1, %v1125_v13, %v1146_v22 }
 0x1a3   : > { %v1150_v1 = vsel %vm469_vm1, %v1141_v43, %v1149_v61 }
 0x1a4   : > { %v927_v8 = vpop.permute.xlu0 %926  ;;  %v1151_v12 = vsel %vm471_vm2, %v1145_v4, %v1150_v1 }
 0x1a5   : > { %v955_v41 = vrot.slane %v927_v8, %v1738_v34  ;;  %v1157_v19 = vsel %vm478_vm3, %v1151_v12, 0.0 }
 0x1a7   : > { %v974_v49 = vsel %vm471_vm2, %v955_v41, %v973_v44 }
 0x1a8   : > { %v939_v54 = vpop.permute.xlu0 %938  ;;  %v980_v55 = vsel %vm478_vm3, %v974_v49, 0.0 }
 0x1a9   : > { %v971_v62 = vrot.slane %v939_v54, %v1738_v34  ;;  %981 = vadd.xlane.f32.xlu1 %v980_v55 }
 0x1ab   : > { %v977_v6 = vsel %vm471_vm2, %v971_v62, %v976_v0 }
 0x1ac   : > { %v1101_v15 = vpop.permute.xlu0 %1100  ;;  %v983_v17 = vsel %vm478_vm3, %v977_v6, 0.0 }
 0x1ad   : > { %v1129_v21 = vrot.slane %v1101_v15, %v1738_v34  ;;  %687 = vadd.xlane.f32.xlu1 %v686_v16  ;;  %984 = vadd.xlane.f32.xlu0 %v983_v17 }
 0x1af   : > { %v1148_v30 = vsel %vm471_vm2, %v1129_v21, %v1147_v24 }
 0x1b0   : > { %v1154_v7 = vsel %vm478_vm3, %v1148_v30, 0.0 }
 0x1b1   : > { %1158 = vadd.xlane.f32.xlu1 %v1157_v19  ;;  %690 = vadd.xlane.f32.xlu0 %v689_v23 }
 0x1b5   : > { %1155 = vadd.xlane.f32.xlu0 %v1154_v7 }
 0x1c5   : > { %v481_v34 = vpop.xlane.xlu1 %480 }
 0x1c6   : > { %v485_v31 = vmax.f32 %v481_v34, 0.0 }
 0x1c8   : > { %v520_v32 = vmul.f32 %v1706_v56, %v485_v31  ;;  %v521_v33 = vmul.f32 %v1710_v58, %v485_v31  ;;  %v522_v35 = vmul.f32 %v1712_v60, %v485_v31  ;;  %v523_v36 = vmul.f32 %v1708_v57, %v485_v31 }
 0x1ca   : > { %537 = vperm.xlu1 %1529, %v520_v32   ;;  %v1841_v32 = vsub.s32 %v1732_v27, %v1645_v9 }
 0x1cb   : > { %540 = vperm.xlu0 %1528, %v521_v33  }
 0x1ce   : > { %543 = vperm.xlu1 %1529, %v522_v35  }
 0x1cf   : > { %546 = vperm.xlu0 %1528, %v523_v36  }
 0x1d9   : > { %v484_v37 = vpop.xlane.xlu0 %483 }
 0x1da   : > { %v486_v8 = vmax.f32 %v484_v37, 0.0 }
 0x1dc   : > { %v525_v38 = vmul.f32 %v1710_v58, %v486_v8  ;;  %v524_v39 = vmul.f32 %v1706_v56, %v486_v8  ;;  %v527_v40 = vmul.f32 %v1708_v57, %v486_v8  ;;  %v526_v41 = vmul.f32 %v1712_v60, %v486_v8 }
 0x1de   : > { %552 = vperm.xlu0 %1528, %v525_v38   ;;  %549 = vperm.xlu1 %1529, %v524_v39  }
 0x1e2   : > { %558 = vperm.xlu0 %1528, %v527_v40   ;;  %555 = vperm.xlu1 %1529, %v526_v41  }
 0x236   : > { %v982_v42 = vpop.xlane.xlu1 %981 }
 0x237   : > { %v986_v43 = vmax.f32 %v982_v42, 0.0 }
 0x239   : > { %v989_v44 = vmul.f32 %v986_v43, %v1710_v58  ;;  %v988_v45 = vmul.f32 %v986_v43, %v1706_v56  ;;  %v990_v50 = vmul.f32 %v986_v43, %v1712_v60  ;;  %v991_v55 = vmul.f32 %v986_v43, %v1708_v57 }
 0x23a   : > { %v985_v46 = vpop.xlane.xlu0 %984  ;;  %v688_v52 = vpop.xlane.xlu1 %687 }
 0x23b   : > { %v987_v47 = vmax.f32 %v985_v46, 0.0  ;;  %1008 = vperm.xlu0 %1528, %v989_v44   ;;  %1005 = vperm.xlu1 %1529, %v988_v45   ;;  %v692_v53 = vmax.f32 %v688_v52, 0.0 }
 0x23d   : > { %v993_v48 = vmul.f32 %v987_v47, %v1710_v58  ;;  %v992_v49 = vmul.f32 %v987_v47, %v1706_v56  ;;  %v994_v51 = vmul.f32 %v987_v47, %v1712_v60  ;;  %v995_v54 = vmul.f32 %v987_v47, %v1708_v57 }
 0x23e   : > { %v691_v59 = vpop.xlane.xlu0 %690  ;;  %v694_v61 = vmul.f32 %v692_v53, %v1706_v56  ;;  %v695_v62 = vmul.f32 %v692_v53, %v1710_v58  ;;  %v697_v0 = vmul.f32 %v692_v53, %v1708_v57  ;;  %v696_v1 = vmul.f32 %v692_v53, %v1712_v60  ;;  %v1159_v13 = vpop.xlane.xlu1 %1158 }
 0x23f   : > { %1020 = vperm.xlu0 %1528, %v993_v48   ;;  %1017 = vperm.xlu1 %1529, %v992_v49   ;;  %v693_v63 = vmax.f32 %v691_v59, 0.0  ;;  %v1161_v15 = vmax.f32 %v1159_v13, 0.0 }
 0x241   : > { %v699_v6 = vmul.f32 %v693_v63, %v1710_v58  ;;  %v698_v11 = vmul.f32 %v693_v63, %v1706_v56  ;;  %v1167_v18 = vmul.f32 %v1161_v15, %v1710_v58  ;;  %v1166_v20 = vmul.f32 %v1161_v15, %v1706_v56 }
 0x242   : > { %v1156_v4 = vpop.xlane.xlu0 %1155  ;;  %v700_v12 = vmul.f32 %v693_v63, %v1712_v60  ;;  %v701_v22 = vmul.f32 %v693_v63, %v1708_v57  ;;  %v1168_v19 = vmul.f32 %v1161_v15, %v1712_v60  ;;  %v1169_v23 = vmul.f32 %v1161_v15, %v1708_v57 }
 0x243   : > { %1011 = vperm.xlu0 %1528, %v990_v50   ;;  %1023 = vperm.xlu1 %1529, %v994_v51   ;;  %v1160_v3 = vmax.f32 %v1156_v4, 0.0 }
 0x245   : > { %v1163_v16 = vmul.f32 %v1160_v3, %v1710_v58  ;;  %v1162_v17 = vmul.f32 %v1160_v3, %v1706_v56  ;;  %v1164_v21 = vmul.f32 %v1160_v3, %v1712_v60  ;;  %v1165_v58 = vmul.f32 %v1160_v3, %v1708_v57 }
 0x247   : > { %1026 = vperm.xlu0 %1528, %v995_v54   ;;  %1014 = vperm.xlu1 %1529, %v991_v55  }
 0x249   : > { %v538_v56 = vpop.permute.xlu1 %537 }
 0x24a   : > { %v541_v24 = vpop.permute.xlu0 %540  ;;  %v563_v38 = vrot.slane %v538_v56, %v1841_v32 }
 0x24b   : > { %711 = vperm.xlu0 %1528, %v694_v61   ;;  %714 = vperm.xlu1 %1529, %v695_v62   ;;  %v567_v39 = vrot.slane %v541_v24, %v1841_v32 }
 0x24d   : > { %v544_v30 = vpop.permute.xlu1 %543  ;;  %v592_v43 = vsel %vm467_vm0, %v567_v39, %v563_v38 }
 0x24e   : > { %v547_v7 = vpop.permute.xlu0 %546  ;;  %v571_v41 = vrot.slane %v544_v30, %v1841_v32 }
 0x24f   : > { %720 = vperm.xlu0 %1528, %v697_v0   ;;  %717 = vperm.xlu1 %1529, %v696_v1   ;;  %v575_v44 = vrot.slane %v547_v7, %v1841_v32 }
 0x250   : > { %v593_v45 = vsel %vm469_vm1, %v571_v41, %v592_v43 }
 0x251   : > { %v594_v47 = vsel %vm471_vm2, %v575_v44, %v593_v45 }
 0x252   : > { %v600_v48 = vsel %vm478_vm3, %v594_v47, 0.0 }
 0x253   : > { %726 = vperm.xlu0 %1528, %v699_v6   ;;  %723 = vperm.xlu1 %1529, %v698_v11  }
 0x257   : > { %1182 = vperm.xlu0 %1528, %v1163_v16   ;;  %1179 = vperm.xlu1 %1529, %v1162_v17  }
 0x25b   : > { %1194 = vperm.xlu0 %1528, %v1167_v18   ;;  %1191 = vperm.xlu1 %1529, %v1166_v20  }
 0x25d   : > { %v550_v34 = vpop.permute.xlu1 %549  ;;  %v553_v31 = vpop.permute.xlu0 %552 }
 0x25e   : > { %v579_v60 = vrot.slane %v550_v34, %v1841_v32  ;;  %v583_v35 = vrot.slane %v553_v31, %v1841_v32 }
 0x25f   : > { %1185 = vperm.xlu0 %1528, %v1164_v21   ;;  %729 = vperm.xlu1 %1529, %v700_v12  }
 0x260   : > { %v595_v37 = vsel %vm467_vm0, %v583_v35, %v579_v60 }
 0x261   : > { %v556_v33 = vpop.permute.xlu1 %555  ;;  %v559_v57 = vpop.permute.xlu0 %558 }
 0x262   : > { %v587_v36 = vrot.slane %v556_v33, %v1841_v32  ;;  %v591_v8 = vrot.slane %v559_v57, %v1841_v32 }
 0x263   : > { %732 = vperm.xlu0 %1528, %v701_v22   ;;  %1197 = vperm.xlu1 %1529, %v1168_v19  }
 0x264   : > { %v596_v40 = vsel %vm469_vm1, %v587_v36, %v595_v37 }
 0x265   : > { %v597_v42 = vsel %vm471_vm2, %v591_v8, %v596_v40 }
 0x266   : > { %v603_v46 = vsel %vm478_vm3, %v597_v42, 0.0 }
 0x267   : > { %1200 = vperm.xlu0 %1528, %v1169_v23   ;;  %1188 = vperm.xlu1 %1529, %v1165_v58  }
 0x286   : > { %604 = vadd.xlane.f32.xlu0 %v603_v46 }
 0x28b   : > { %601 = vadd.xlane.f32.xlu1 %v600_v48 }
 0x2ba   : > { %v1006_v49 = vpop.permute.xlu1 %1005  ;;  %v1009_v50 = vpop.permute.xlu0 %1008 }
 0x2bb   : > { %v1031_v55 = vrot.slane %v1006_v49, %v1841_v32  ;;  %v1035_v59 = vrot.slane %v1009_v50, %v1841_v32 }
 0x2bd   : > { %v1060_v3 = vsel %vm467_vm0, %v1035_v59, %v1031_v55 }
 0x2be   : > { %v1018_v51 = vpop.permute.xlu1 %1017  ;;  %v1021_v52 = vpop.permute.xlu0 %1020 }
 0x2bf   : > { %v1047_v61 = vrot.slane %v1018_v51, %v1841_v32  ;;  %v1051_v62 = vrot.slane %v1021_v52, %v1841_v32 }
 0x2c1   : > { %v1063_v6 = vsel %vm467_vm0, %v1051_v62, %v1047_v61 }
 0x2c2   : > { %v1024_v53 = vpop.permute.xlu1 %1023  ;;  %v1012_v54 = vpop.permute.xlu0 %1011 }
 0x2c3   : > { %v1055_v63 = vrot.slane %v1024_v53, %v1841_v32  ;;  %v1039_v0 = vrot.slane %v1012_v54, %v1841_v32 }
 0x2c5   : > { %v1061_v15 = vsel %vm469_vm1, %v1039_v0, %v1060_v3  ;;  %v1064_v16 = vsel %vm469_vm1, %v1055_v63, %v1063_v6 }
 0x2c6   : > { %v1015_v1 = vpop.permute.xlu1 %1014  ;;  %v1027_v4 = vpop.permute.xlu0 %1026 }
 0x2c7   : > { %v1043_v11 = vrot.slane %v1015_v1, %v1841_v32  ;;  %v1059_v13 = vrot.slane %v1027_v4, %v1841_v32 }
 0x2c9   : > { %v1062_v17 = vsel %vm471_vm2, %v1043_v11, %v1061_v15  ;;  %v1065_v18 = vsel %vm471_vm2, %v1059_v13, %v1064_v16 }
 0x2ca   : > { %v715_v20 = vpop.permute.xlu1 %714  ;;  %v712_v21 = vpop.permute.xlu0 %711  ;;  %v1068_v12 = vsel %vm478_vm3, %v1062_v17, 0.0  ;;  %v1071_v22 = vsel %vm478_vm3, %v1065_v18, 0.0 }
 0x2cb   : > { %1069 = vadd.xlane.f32.xlu0 %v1068_v12  ;;  %1072 = vadd.xlane.f32.xlu1 %v1071_v22  ;;  %v741_v19 = vrot.slane %v715_v20, %v1841_v32  ;;  %v737_v23 = vrot.slane %v712_v21, %v1841_v32 }
 0x2cd   : > { %v766_v7 = vsel %vm467_vm0, %v741_v19, %v737_v23 }
 0x2ce   : > { %v718_v58 = vpop.permute.xlu1 %717  ;;  %v721_v56 = vpop.permute.xlu0 %720 }
 0x2cf   : > { %v745_v24 = vrot.slane %v718_v58, %v1841_v32  ;;  %v749_v30 = vrot.slane %v721_v56, %v1841_v32 }
 0x2d1   : > { %v767_v34 = vsel %vm469_vm1, %v745_v24, %v766_v7 }
 0x2d2   : > { %v724_v31 = vpop.permute.xlu1 %723  ;;  %v727_v33 = vpop.permute.xlu0 %726  ;;  %v768_v60 = vsel %vm471_vm2, %v749_v30, %v767_v34 }
 0x2d3   : > { %v774_v35 = vsel %vm478_vm3, %v768_v60, 0.0  ;;  %v753_v38 = vrot.slane %v724_v31, %v1841_v32  ;;  %v757_v39 = vrot.slane %v727_v33, %v1841_v32 }
 0x2d4   : > { %775 = vadd.xlane.f32.xlu1 %v774_v35 }
 0x2d5   : > { %v769_v43 = vsel %vm467_vm0, %v757_v39, %v753_v38  ;;  %v796_v38 = vadd.s32 4294967292, %v1732_v27 }
 0x2d6   : > { %v1180_v36 = vpop.permute.xlu1 %1179  ;;  %v1183_v57 = vpop.permute.xlu0 %1182 }
 0x2d7   : > { %v1205_v44 = vrot.slane %v1180_v36, %v1841_v32  ;;  %v1209_v47 = vrot.slane %v1183_v57, %v1841_v32  ;;  %v799_v39 = vsub.s32 %v796_v38, %v1645_v9 }
 0x2d9   : > { %v1234_v62 = vsel %vm467_vm0, %v1209_v47, %v1205_v44 }
 0x2da   : > { %v1192_v37 = vpop.permute.xlu1 %1191  ;;  %v1195_v8 = vpop.permute.xlu0 %1194 }
 0x2db   : > { %v1221_v48 = vrot.slane %v1192_v37, %v1841_v32  ;;  %v1225_v49 = vrot.slane %v1195_v8, %v1841_v32 }
 0x2dd   : > { %v1237_v63 = vsel %vm467_vm0, %v1225_v49, %v1221_v48 }
 0x2de   : > { %v730_v40 = vpop.permute.xlu1 %729  ;;  %v1186_v41 = vpop.permute.xlu0 %1185 }
 0x2df   : > { %v761_v42 = vrot.slane %v730_v40, %v1841_v32  ;;  %v1213_v51 = vrot.slane %v1186_v41, %v1841_v32 }
 0x2e1   : > { %v770_v53 = vsel %vm469_vm1, %v761_v42, %v769_v43  ;;  %v1235_v4 = vsel %vm469_vm1, %v1213_v51, %v1234_v62 }
 0x2e2   : > { %v1198_v45 = vpop.permute.xlu1 %1197  ;;  %v733_v46 = vpop.permute.xlu0 %732 }
 0x2e3   : > { %v765_v50 = vrot.slane %v733_v46, %v1841_v32  ;;  %v1229_v52 = vrot.slane %v1198_v45, %v1841_v32 }
 0x2e5   : > { %v771_v54 = vsel %vm471_vm2, %v765_v50, %v770_v53  ;;  %v1238_v3 = vsel %vm469_vm1, %v1229_v52, %v1237_v63 }
 0x2e6   : > { %v1189_v55 = vpop.permute.xlu1 %1188  ;;  %v1201_v59 = vpop.permute.xlu0 %1200  ;;  %v777_v61 = vsel %vm478_vm3, %v771_v54, 0.0 }
 0x2e7   : > { %v1217_v0 = vrot.slane %v1189_v55, %v1841_v32  ;;  %v1233_v1 = vrot.slane %v1201_v59, %v1841_v32  ;;  %778 = vadd.xlane.f32.xlu0 %v777_v61  ;;  %v1488_v55 = vld.sshfl [vmem:[%s305_s8] sm:$0x33 pattern:$0x75316420] }
 0x2e8   : > { %v820_v59 = vcombine.high %v1488_v55, %v1488_v55  ;;  %v1496_v61 = vld.sshfl [vmem:[%s305_s8 + $0x4] sm:$0x33 pattern:$0x75316420] }
 0x2e9   : > { %v1236_v6 = vsel %vm471_vm2, %v1217_v0, %v1235_v4  ;;  %v1239_v11 = vsel %vm471_vm2, %v1233_v1, %v1238_v3  ;;  %v1283_v62 = vcombine.high %v1496_v61, %v1496_v61  ;;  %v840_v1 = vrot.slane %v1488_v55, %v1656_v14  ;;  %v867_v3 = vld [vmem:[%s1923_s11 + $0x20] sm:$0xff] }
 0x2ea   : > { %v1242_v13 = vsel %vm478_vm3, %v1236_v6, 0.0  ;;  %v1245_v15 = vsel %vm478_vm3, %v1239_v11, 0.0  ;;  %v848_v63 = vrot.slane %v820_v59, %v1656_v14  ;;  %v852_v0 = vrot.slane %v820_v59, %v1648_v10 }
 0x2eb   : > { %1243 = vadd.xlane.f32.xlu0 %v1242_v13  ;;  %1246 = vadd.xlane.f32.xlu1 %v1245_v15  ;;  %v844_v4 = vrot.slane %v1488_v55, %v1648_v10  ;;  %v1301_v13 = vrot.slane %v1496_v61, %v1656_v14  ;;  %v1305_v15 = vrot.slane %v1496_v61, %v1648_v10 }
 0x313   : > { %v605_v32 = vpop.xlane.xlu0 %604 }
 0x318   : > { %v602_v16 = vpop.xlane.xlu1 %601 }
 0x358   : > { %v1073_v17 = vpop.xlane.xlu1 %1072  ;;  %v1070_v12 = vpop.xlane.xlu0 %1069 }
 0x361   : > { %v776_v18 = vpop.xlane.xlu1 %775 }
 0x362   : > { %v780_v20 = vadd.f32 %v776_v18, %v602_v16  ;;  %v1309_v16 = vrot.slane %v1283_v62, %v1656_v14  ;;  %v868_v18 = vld [vmem:[%s1923_s11 + $0x28] sm:$0xff] }
 0x364   : > { %v1486_v21 = vmul.f32 -1.442695, %v780_v20 }
 0x366   : > { %1530 = vpow2.f32 %v1486_v21  ;;  %v865_v21 = vld [vmem:[%s1923_s11] sm:$0xff] }
 0x370   : > { %v1531_v31 = vpop.eup %1530 }
 0x371   : > { %v788_v33 = vadd.f32 1.0, %v1531_v31 }
 0x374   : > { %v779_v22 = vpop.xlane.xlu0 %778 }
 0x375   : > { %v781_v19 = vadd.f32 %v779_v22, %v605_v32 }
 0x377   : > { %v1487_v23 = vmul.f32 -1.442695, %v781_v19 }
 0x378   : > { %v1247_v58 = vpop.xlane.xlu1 %1246  ;;  %v1244_v56 = vpop.xlane.xlu0 %1243 }
 0x379   : > { %1532 = vpow2.f32 %v1487_v23  ;;  %v1249_v24 = vadd.f32 %v1247_v58, %v1073_v17  ;;  %v1248_v30 = vadd.f32 %v1244_v56, %v1070_v12  ;;  %v1313_v17 = vrot.slane %v1283_v62, %v1648_v10  ;;  %v866_v12 = vld [vmem:[%s1923_s11 + $0x8] sm:$0xff]  ;;  %v1546_v23 = vld [vmem:[%s1630_s25] sm:$0xff] }
 0x37a   : > { %v1547_v56 = vld [vmem:[%s1630_s25 + $0x8] sm:$0xff] }
 0x37b   : > { %v1495_v7 = vmul.f32 -1.442695, %v1249_v24  ;;  %v1494_v34 = vmul.f32 -1.442695, %v1248_v30 }
 0x37d   : > { %1534 = vpow2.f32 %v1495_v7 }
 0x37e   : > { %1536 = vpow2.f32 %v1494_v34 }
 0x37f   : > { %1538 = vrcp.f32 %v788_v33  ;;  %v1326_v33 = vld [vmem:[%s1923_s11 + $0x10] sm:$0xff] }
 0x383   : > { %v1533_v60 = vpop.eup %1532 }
 0x384   : > { %v789_v35 = vadd.f32 1.0, %v1533_v60 }
 0x386   : > { %1540 = vrcp.f32 %v789_v35 }
 0x387   : > { %v1535_v36 = vpop.eup %1534 }
 0x388   : > { %v1537_v57 = vpop.eup %1536  ;;  %v1257_v37 = vadd.f32 1.0, %v1535_v36 }
 0x389   : > { %v1256_v8 = vadd.f32 1.0, %v1537_v57  ;;  %v1539_v40 = vpop.eup %1538  ;;  %v1328_v57 = vld [vmem:[%s1923_s11 + $0x30] sm:$0xff] }
 0x38a   : > { %1542 = vrcp.f32 %v1257_v37  ;;  %v800_v42 = vrot.slane %v1539_v40, %v799_v39  ;;  %v1329_v37 = vld [vmem:[%s1923_s11 + $0x38] sm:$0xff] }
 0x38b   : > { %1544 = vrcp.f32 %v1256_v8 }
 0x390   : > { %v1541_v41 = vpop.eup %1540 }
 0x391   : > { %v804_v43 = vrot.slane %v1541_v41, %v799_v39 }
 0x393   : > { %v805_v44 = vsel %vm467_vm0, %v804_v43, %v800_v42 }
 0x394   : > { %v1543_v45 = vpop.eup %1542  ;;  %v808_v46 = vsel %vm807_vm4, 0.0, %v805_v44 }
 0x395   : > { %v1545_v47 = vpop.eup %1544  ;;  %v831_v48 = vrot.slane %v808_v46, %v1648_v10  ;;  %v1271_v49 = vrot.slane %v1543_v45, %v799_v39  ;;  %v824_v27 = vrot.slane %v808_v46, %v1656_v14 }
 0x396   : > { %v1267_v50 = vrot.slane %v1545_v47, %v799_v39 }
 0x397   : > { %833 = vbcast.lane.b32.xlu1 %v831_v48, 256  ;;  %826 = vbcast.lane.b32.xlu0 %v824_v27, 256 }
 0x398   : > { %v1272_v51 = vsel %vm467_vm0, %v1271_v49, %v1267_v50 }
 0x399   : > { %v1274_v52 = vsel %vm807_vm4, 0.0, %v1272_v51 }
 0x39a   : > { %v1294_v53 = vrot.slane %v1274_v52, %v1648_v10  ;;  %v1287_v54 = vrot.slane %v1274_v52, %v1656_v14 }
 0x39c   : > { %1296 = vbcast.lane.b32.xlu0 %v1294_v53, 256  ;;  %1289 = vbcast.lane.b32.xlu1 %v1287_v54, 256 }
 0x409   : > { %v834_v6 = vpop.permute.xlu1 %833  ;;  %v827_v11 = vpop.permute.xlu0 %826 }
 0x40a   : > { %v859_v20 = vsel %vm811_vm5, %v848_v63, %v834_v6  ;;  %v860_v32 = vsel %vm811_vm5, %v852_v0, %v834_v6  ;;  %v857_v22 = vsel %vm811_vm5, %v840_v1, %v827_v11  ;;  %v858_v19 = vsel %vm811_vm5, %v844_v4, %v827_v11 }
 0x40b   : > { %v863_v14 = vmul.f32 %v859_v20, %v1635_v2  ;;  %v864_v10 = vmul.f32 %v860_v32, %v1638_v5  ;;  %v861_v58 = vmul.f32 %v1546_v23, %v857_v22  ;;  %v862_v24 = vmul.f32 %v1547_v56, %v858_v19  ;;  %v1327_v5 = vld [vmem:[%s1923_s11 + $0x18] sm:$0xff] }
 0x40d   : > { %v871_v30 = vadd.f32 %v867_v3, %v863_v14  ;;  %v872_v7 = vadd.f32 %v868_v18, %v864_v10  ;;  %v869_v34 = vadd.f32 %v865_v21, %v861_v58  ;;  %v870_v31 = vadd.f32 %v866_v12, %v862_v24 }
 0x40e   : > { %v1290_v60 = vpop.permute.xlu1 %1289  ;;  %v1297_v2 = vpop.permute.xlu0 %1296 }
 0x40f   : > { %875 = vst [vmem:[%s326_s14 + $0x20] sm:$0xff] %v871_v30  ;;  %876 = vst [vmem:[%s326_s14 + $0x28] sm:$0xff] %v872_v7  ;;  %v1318_v35 = vsel %vm811_vm5, %v1301_v13, %v1290_v60  ;;  %v1319_v36 = vsel %vm811_vm5, %v1305_v15, %v1290_v60  ;;  %v1320_v8 = vsel %vm811_vm5, %v1309_v16, %v1297_v2 }
 0x410   : > { %873 = vst [vmem:[%s326_s14] sm:$0xff] %v869_v34  ;;  %874 = vst [vmem:[%s326_s14 + $0x8] sm:$0xff] %v870_v31  ;;  %v1321_v38 = vsel %vm811_vm5, %v1313_v17, %v1297_v2  ;;  %v1322_v39 = vmul.f32 %v1666_v25, %v1318_v35  ;;  %v1323_v40 = vmul.f32 %v1669_v26, %v1319_v36 }
 0x411   : > { %v1324_v41 = vmul.f32 %v1674_v28, %v1320_v8  ;;  %v1325_v42 = vmul.f32 %v1677_v29, %v1321_v38 }
 0x412   : > { %v1330_v43 = vadd.f32 %v1326_v33, %v1322_v39  ;;  %v1331_v44 = vadd.f32 %v1327_v5, %v1323_v40 }
 0x413   : > { %v1332_v45 = vadd.f32 %v1328_v57, %v1324_v41  ;;  %v1333_v46 = vadd.f32 %v1329_v37, %v1325_v42 }
 0x414   : > { %1334 = vst [vmem:[%s326_s14 + $0x10] sm:$0xff] %v1330_v43  ;;  %1335 = vst [vmem:[%s326_s14 + $0x18] sm:$0xff] %v1331_v44 }
 0x415   : > { %1336 = vst [vmem:[%s326_s14 + $0x30] sm:$0xff] %v1332_v45  ;;  %1337 = vst [vmem:[%s326_s14 + $0x38] sm:$0xff] %v1333_v46 }
 0x416 PF: > { %s15_s20 = sadd.s32 1, %s1570_s20   ;;  %s1985_s18 = smov %s1566_s19 }
 0x417   : > { %p12_p5 = scmp.ge.s32.totalorder %s15_s20, 4   ;;  %s1986_s19 = smov %s1988_s21 }
 0x419   :  { %14 = sbr.rel (!%p12_p5) target bundleno = 2 (0x2), region = 79 }

</bundles_post_ra>
